<compile_context>
chip_gen: v7x
topology: tpu7x:2x2x1
jax: 0.10.0
libtpu: 0.0.40
codegen_flags: <defaults>
</compile_context>

<pallas_src>
import functools

import jax
import jax.numpy as jnp
from jax import lax
from jax.experimental import pallas as pl
from jax.experimental.pallas import tpu as pltpu


def _mha_kernel(*refs, head_size, has_bias, mxu_dtype):
    if has_bias:
        (q_ref, k_ref, v_ref, bias_ref,
         wq_ref, bq_ref, wk_ref, bk_ref, wv_ref, bv_ref, wo_ref, bo_ref,
         o_ref, kp_scr, vp_scr, ctx_scr) = refs
    else:
        (q_ref, k_ref, v_ref,
         wq_ref, bq_ref, wk_ref, bk_ref, wv_ref, bv_ref, wo_ref, bo_ref,
         o_ref, kp_scr, vp_scr, ctx_scr) = refs
        bias_ref = None

    bb, tq, hidden = q_ref.shape           # batch-block, q-tile rows, model dim
    seq = k_ref.shape[1]
    d = hidden // head_size

    # ---- K/V projections: ONCE per batch-block. Scratch carries across the q-tile
    #      grid axis (marked "arbitrary"), so they are not recomputed per q-tile.
    @pl.when(pl.program_id(1) == 0)
    def _():
        xk = k_ref[...].reshape(bb * seq, hidden)
        xv = v_ref[...].reshape(bb * seq, hidden)
        kp = jnp.dot(xk, wk_ref[...], preferred_element_type=jnp.float32) + bk_ref[...]
        vp = jnp.dot(xv, wv_ref[...], preferred_element_type=jnp.float32) + bv_ref[...]
        kp_scr[...] = kp.astype(kp_scr.dtype)
        vp_scr[...] = vp.astype(vp_scr.dtype)

    # ---- Q projection for this tile. Wq/bq were pre-scaled by 1/sqrt(d) in the
    #      wrapper, so no per-head scaling is needed.
    xq = q_ref[...].reshape(bb * tq, hidden)
    qp = jnp.dot(xq, wq_ref[...], preferred_element_type=jnp.float32) + bq_ref[...]
    if mxu_dtype is not None:
        qp = qp.astype(mxu_dtype)

    # ---- Per batch-entry, per-head attention. Static loops => compile-time-constant
    #      slices (no cross-lane gathers).
    # TODO(synk): for head_size >= 8, switch the head loop to lax.fori_loop with
    # pl.ds(h*d, d) slices to bound live ranges of the (tq, seq) intermediates.
    for b in range(bb):
        kp_b = kp_scr[b * seq:(b + 1) * seq, :]          # (seq, hidden)
        vp_b = vp_scr[b * seq:(b + 1) * seq, :]
        for h in range(head_size):
            c0, c1 = h * d, (h + 1) * d
            qh = qp[b * tq:(b + 1) * tq, c0:c1]           # (tq, d)
            kh = kp_b[:, c0:c1]                           # (seq, d)
            vh = vp_b[:, c0:c1]                           # (seq, d)

            # Contract both operands on the last dim -> no kh.T / XLU transpose.
            s = lax.dot_general(qh, kh, (((1,), (1,)), ((), ())),
                                preferred_element_type=jnp.float32)   # (tq, seq)
            if has_bias:
                s = s + bias_ref[b, h]

            m = jnp.max(s, axis=-1, keepdims=True)
            p = jnp.exp(s - m)
            r = jnp.sum(p, axis=-1, keepdims=True)
            # TODO(synk): attention dropout is identity at inference; training-mode
            # dropout would use pltpu.prng_seed + pltpu.prng_random_bits masking.
            pv = jnp.dot(p.astype(vh.dtype), vh,
                         preferred_element_type=jnp.float32)           # (tq, d)
            # Deferred softmax normalization: scale the (tq, d) context instead of
            # dividing the (tq, seq) probability matrix.
            ctx_scr[b * tq:(b + 1) * tq, c0:c1] = pv * pl.reciprocal(r, approx=False)

    # ---- Single full-contraction output projection (all heads at once).
    ctx = ctx_scr[...]
    if mxu_dtype is not None:
        ctx = ctx.astype(mxu_dtype)
    out = jnp.dot(ctx, wo_ref[...], preferred_element_type=jnp.float32) + bo_ref[...]
    o_ref[...] = out.reshape(bb, tq, hidden).astype(o_ref.dtype)


@functools.partial(jax.jit, static_argnames=("head_size", "q_tile", "mxu_dtype"))
def multi_head_attention(q, k, v, wq, bq, wk, bk, wv, bv, wo, bo,
                         attn_bias=None, *, head_size, q_tile=256, mxu_dtype=None):
    """q, k, v: (batch, seq, hidden). Weights stored (in, out). Returns (batch, seq, hidden).

    mxu_dtype: optional MXU operand dtype (e.g. jnp.bfloat16) for v6e/v7x throughput;
    None keeps operands in the input dtype (bit-exact-ish vs. an f32 reference).
    """
    batch, seq, hidden = q.shape
    assert hidden % head_size == 0, "hidden must be divisible by head_size"
    att_size = hidden // head_size
    scale = att_size ** (-0.5)
    orig_dtype = q.dtype

    # Fold the 1/sqrt(d) scale into the Q projection once (constant transform).
    wq = wq * scale
    bq = bq * scale

    if mxu_dtype is not None:
        wq, wk, wv, wo = (w.astype(mxu_dtype) for w in (wq, wk, wv, wo))
        q, k, v = (x.astype(mxu_dtype) for x in (q, k, v))
        if attn_bias is not None:
            attn_bias = attn_bias.astype(mxu_dtype)

    # Query-row tile (128 is a fine choice on v5e; 256 keeps the v6e/v7x MXU fed).
    tq = min(seq, q_tile)
    if seq % tq != 0:
        # TODO(synk): prefer padding seq for large non-multiple sequence lengths
        # instead of making the full sequence resident.
        tq = seq
    num_q_tiles = seq // tq

    # Tiny-problem fast path: process the whole batch in one dense grid step so
    # per-step grid overhead and masked (<128-lane) output stores are amortized.
    if num_q_tiles == 1 and seq % 8 == 0 and batch * seq <= 1024:
        bb = batch
    else:
        bb = 1
    grid = (batch // bb, num_q_tiles)

    bq2 = bq.reshape(1, hidden).astype(jnp.float32)
    bk2 = bk.reshape(1, hidden).astype(jnp.float32)
    bv2 = bv.reshape(1, hidden).astype(jnp.float32)
    bo2 = bo.reshape(1, hidden).astype(jnp.float32)

    has_bias = attn_bias is not None
    kv_dtype = mxu_dtype if mxu_dtype is not None else jnp.float32

    in_specs = [
        pl.BlockSpec((bb, tq, hidden), lambda b, i: (b, i, 0)),    # q tile
        pl.BlockSpec((bb, seq, hidden), lambda b, i: (b, 0, 0)),   # k (full seq, per batch)
        pl.BlockSpec((bb, seq, hidden), lambda b, i: (b, 0, 0)),   # v (full seq, per batch)
    ]
    args = [q, k, v]
    if has_bias:
        in_specs.append(
            pl.BlockSpec((bb, head_size, tq, seq), lambda b, i: (b, 0, i, 0)))
        args.append(attn_bias)
    in_specs += [
        pl.BlockSpec((hidden, hidden), lambda b, i: (0, 0)),       # Wq (resident)
        pl.BlockSpec((1, hidden), lambda b, i: (0, 0)),            # bq
        pl.BlockSpec((hidden, hidden), lambda b, i: (0, 0)),       # Wk
        pl.BlockSpec((1, hidden), lambda b, i: (0, 0)),            # bk
        pl.BlockSpec((hidden, hidden), lambda b, i: (0, 0)),       # Wv
        pl.BlockSpec((1, hidden), lambda b, i: (0, 0)),            # bv
        pl.BlockSpec((hidden, hidden), lambda b, i: (0, 0)),       # Wo
        pl.BlockSpec((1, hidden), lambda b, i: (0, 0)),            # bo
    ]
    args += [wq, bq2, wk, bk2, wv, bv2, wo, bo2]

    scratch_shapes = [
        pltpu.VMEM((bb * seq, hidden), kv_dtype),    # kp (persists across q-tiles)
        pltpu.VMEM((bb * seq, hidden), kv_dtype),    # vp
        pltpu.VMEM((bb * tq, hidden), jnp.float32),  # per-head contexts -> one Wo matmul
    ]

    # ---- VMEM budget: double-buffered streamed blocks + resident weights + scratch
    #      + f32 intermediates, 2x headroom, capped below v7x's 64 MiB physical VMEM.
    in_isz = jnp.dtype(q.dtype).itemsize
    w_isz = jnp.dtype(wq.dtype).itemsize
    kv_isz = jnp.dtype(kv_dtype).itemsize
    bias_isz = jnp.dtype(attn_bias.dtype).itemsize if has_bias else 0
    io_blocks = (bb * tq * hidden + 2 * bb * seq * hidden) * in_isz
    out_block = bb * tq * hidden * jnp.dtype(orig_dtype).itemsize
    bias_block = bb * head_size * tq * seq * bias_isz if has_bias else 0
    weights = 4 * hidden * hidden * w_isz + 4 * hidden * 4
    scratch = 2 * bb * seq * hidden * kv_isz + bb * tq * hidden * 4
    inter = (2 * bb * tq * hidden + 2 * tq * seq + tq * hidden) * 4
    est = 2 * (io_blocks + out_block + bias_block + weights) + scratch + inter
    vmem_limit = int(min(56 * 2**20, max(32 * 2**20, 2 * est)))

    # ---- Advisory cost (K/V projections counted exactly once now).
    flops = (2 * batch * seq * hidden * hidden * 4                      # 4 linear layers
             + 2 * batch * head_size * seq * seq * att_size * 2)        # qk^T and attn@v
    transcendentals = batch * head_size * seq * seq
    bytes_accessed = (4 * batch * seq * hidden * in_isz
                      + 4 * hidden * hidden * w_isz + 4 * hidden * 4
                      + (batch * head_size * seq * seq * bias_isz if has_bias else 0))

    kernel = functools.partial(_mha_kernel, head_size=head_size,
                               has_bias=has_bias, mxu_dtype=mxu_dtype)

    out = pl.pallas_call(
        kernel,
        out_shape=jax.ShapeDtypeStruct((batch, seq, hidden), orig_dtype),
        grid_spec=pltpu.PrefetchScalarGridSpec(
            num_scalar_prefetch=0,
            grid=grid,
            in_specs=in_specs,
            out_specs=pl.BlockSpec((bb, tq, hidden), lambda b, i: (b, i, 0)),
            scratch_shapes=scratch_shapes,
        ),
        compiler_params=pltpu.CompilerParams(
            # batch axis parallel (megacore on v7x); q-tile axis arbitrary so the
            # K/V-projection scratch carries across q-tiles.
            dimension_semantics=("parallel", "arbitrary"),
            vmem_limit_bytes=vmem_limit),
        cost_estimate=pl.CostEstimate(flops=int(flops),
                                      transcendentals=int(transcendentals),
                                      bytes_accessed=int(bytes_accessed)),
    )(*args)
    return out


def _ref_mha(q, k, v, wq, bq, wk, bk, wv, bv, wo, bo, head_size, attn_bias=None):
    batch, seq, hidden = q.shape
    d = hidden // head_size
    scale = d ** (-0.5)
    qp = (q @ wq + bq).reshape(batch, seq, head_size, d).transpose(0, 2, 1, 3)
    kp = (k @ wk + bk).reshape(batch, seq, head_size, d).transpose(0, 2, 1, 3)
    vp = (v @ wv + bv).reshape(batch, seq, head_size, d).transpose(0, 2, 1, 3)
    s = jnp.einsum('bhqd,bhkd->bhqk', qp * scale, kp)
    if attn_bias is not None:
        s = s + attn_bias
    a = jax.nn.softmax(s, axis=-1)
    ctx = jnp.einsum('bhqk,bhkd->bhqd', a, vp)
    ctx = ctx.transpose(0, 2, 1, 3).reshape(batch, seq, hidden)
    return ctx @ wo + bo


if __name__ == "__main__":
    # Small shapes consistent with the module: hidden=32, head_size=4, batch=2, seq=8.
    batch, seq, hidden, head_size = 2, 8, 32, 4
    key = jax.random.PRNGKey(0)
    keys = jax.random.split(key, 12)

    q = jax.random.normal(keys[0], (batch, seq, hidden), jnp.float32)
    k = jax.random.normal(keys[1], (batch, seq, hidden), jnp.float32)
    v = jax.random.normal(keys[2], (batch, seq, hidden), jnp.float32)

    lim = 1.0 / (hidden ** 0.5)
    def u(kk, shape):
        return jax.random.uniform(kk, shape, jnp.float32, -lim, lim)

    wq, bq = u(keys[3], (hidden, hidden)), u(keys[4], (hidden,))
    wk, bk = u(keys[5], (hidden, hidden)), u(keys[6], (hidden,))
    wv, bv = u(keys[7], (hidden, hidden)), u(keys[8], (hidden,))
    wo, bo = u(keys[9], (hidden, hidden)), u(keys[10], (hidden,))

    attn_bias = 0.1 * jax.random.normal(keys[11], (batch, head_size, seq, seq),
                                        jnp.float32)

    out_b = multi_head_attention(q, k, v, wq, bq, wk, bk, wv, bv, wo, bo,
                                 attn_bias=attn_bias, head_size=head_size)
    out_b = jax.block_until_ready(out_b)

    out_n = multi_head_attention(q, k, v, wq, bq, wk, bk, wv, bv, wo, bo,
                                 attn_bias=None, head_size=head_size)
    out_n = jax.block_until_ready(out_n)

    ref_b = _ref_mha(q, k, v, wq, bq, wk, bk, wv, bv, wo, bo, head_size, attn_bias)
    ref_n = _ref_mha(q, k, v, wq, bq, wk, bk, wv, bv, wo, bo, head_size, None)

    assert out_b.shape == q.shape
    assert jnp.allclose(out_b, ref_b, atol=1e-5, rtol=1e-5), "mismatch (with bias)"
    assert jnp.allclose(out_n, ref_n, atol=1e-5, rtol=1e-5), "mismatch (no bias)"

    print("KERNEL_OK")
</pallas_src>

<mosaic_0001>
module attributes {stable_mosaic.version = 11 : i64} {
  func.func @_mha_kernel(%arg0: i32, %arg1: i32, %arg2: memref<2x8x32xf32, #tpu.memory_space<vmem>>, %arg3: memref<2x8x32xf32, #tpu.memory_space<vmem>>, %arg4: memref<2x8x32xf32, #tpu.memory_space<vmem>>, %arg5: memref<2x4x8x8xf32, #tpu.memory_space<vmem>>, %arg6: memref<32x32xf32, #tpu.memory_space<vmem>>, %arg7: memref<1x32xf32, #tpu.memory_space<vmem>>, %arg8: memref<32x32xf32, #tpu.memory_space<vmem>>, %arg9: memref<1x32xf32, #tpu.memory_space<vmem>>, %arg10: memref<32x32xf32, #tpu.memory_space<vmem>>, %arg11: memref<1x32xf32, #tpu.memory_space<vmem>>, %arg12: memref<32x32xf32, #tpu.memory_space<vmem>>, %arg13: memref<1x32xf32, #tpu.memory_space<vmem>>, %arg14: memref<2x8x32xf32, #tpu.memory_space<vmem>>, %arg15: memref<16x32xf32, #tpu.memory_space<vmem>>, %arg16: memref<16x32xf32, #tpu.memory_space<vmem>>, %arg17: memref<16x32xf32, #tpu.memory_space<vmem>>) attributes {dimension_semantics = [#tpu.dimension_semantics<parallel>, #tpu.dimension_semantics<arbitrary>], iteration_bounds = array<i64: 1, 1>, scalar_prefetch = 0 : i64, scratch_operands = 3 : i64, tpu.core_type = #tpu.core_type<tc>, window_params = [{transform_indices = @transform_0, window_bounds = array<i64: 2, 8, 32>}, {transform_indices = @transform_1, window_bounds = array<i64: 2, 8, 32>}, {transform_indices = @transform_2, window_bounds = array<i64: 2, 8, 32>}, {transform_indices = @transform_3, window_bounds = array<i64: 2, 4, 8, 8>}, {pipeline_mode = #tpu.pipeline_mode<synchronous>, transform_indices = @transform_4, window_bounds = array<i64: 32, 32>}, {pipeline_mode = #tpu.pipeline_mode<synchronous>, transform_indices = @transform_5, window_bounds = array<i64: 1, 32>}, {pipeline_mode = #tpu.pipeline_mode<synchronous>, transform_indices = @transform_6, window_bounds = array<i64: 32, 32>}, {pipeline_mode = #tpu.pipeline_mode<synchronous>, transform_indices = @transform_7, window_bounds = array<i64: 1, 32>}, {pipeline_mode = #tpu.pipeline_mode<synchronous>, transform_indices = @transform_8, window_bounds = array<i64: 32, 32>}, {pipeline_mode = #tpu.pipeline_mode<synchronous>, transform_indices = @transform_9, window_bounds = array<i64: 1, 32>}, {pipeline_mode = #tpu.pipeline_mode<synchronous>, transform_indices = @transform_10, window_bounds = array<i64: 32, 32>}, {pipeline_mode = #tpu.pipeline_mode<synchronous>, transform_indices = @transform_11, window_bounds = array<i64: 1, 32>}, {transform_indices = @transform_12, window_bounds = array<i64: 2, 8, 32>}]} {
    %c0_i32 = arith.constant 0 : i32
    %0 = arith.cmpi eq, %arg1, %c0_i32 : i32
    %1 = arith.extui %0 : i1 to i32
    %c0_i32_0 = arith.constant 0 : i32
    %2 = arith.cmpi ne, %1, %c0_i32_0 : i32
    scf.if %2 {
      %c0_99 = arith.constant 0 : index
      %c0_100 = arith.constant 0 : index
      %c0_101 = arith.constant 0 : index
      %174 = vector.load %arg3[%c0_99, %c0_100, %c0_101] : memref<2x8x32xf32, #tpu.memory_space<vmem>>, vector<2x8x32xf32>
      %175 = vector.shape_cast %174 : vector<2x8x32xf32> to vector<16x32xf32>
      %c0_102 = arith.constant 0 : index
      %c0_103 = arith.constant 0 : index
      %c0_104 = arith.constant 0 : index
      %176 = vector.load %arg4[%c0_102, %c0_103, %c0_104] : memref<2x8x32xf32, #tpu.memory_space<vmem>>, vector<2x8x32xf32>
      %177 = vector.shape_cast %176 : vector<2x8x32xf32> to vector<16x32xf32>
      %c0_105 = arith.constant 0 : index
      %c0_106 = arith.constant 0 : index
      %178 = vector.load %arg8[%c0_105, %c0_106] : memref<32x32xf32, #tpu.memory_space<vmem>>, vector<32x32xf32>
      %cst_107 = arith.constant dense<0.000000e+00> : vector<16x32xf32>
      %179 = tpu.matmul %175, %178, %cst_107 {dimension_numbers = #tpu.dot_dimension_numbers<[1], [0], [0], [1], [0, 0, 1, 1], [], []>} : vector<16x32xf32>, vector<32x32xf32>, vector<16x32xf32> -> vector<16x32xf32>
      %c0_108 = arith.constant 0 : index
      %c0_109 = arith.constant 0 : index
      %180 = vector.load %arg9[%c0_108, %c0_109] : memref<1x32xf32, #tpu.memory_space<vmem>>, vector<1x32xf32>
      %181 = vector.broadcast %180 : vector<1x32xf32> to vector<16x32xf32>
      %182 = arith.addf %179, %181 : vector<16x32xf32>
      %c0_110 = arith.constant 0 : index
      %c0_111 = arith.constant 0 : index
      %183 = vector.load %arg10[%c0_110, %c0_111] : memref<32x32xf32, #tpu.memory_space<vmem>>, vector<32x32xf32>
      %cst_112 = arith.constant dense<0.000000e+00> : vector<16x32xf32>
      %184 = tpu.matmul %177, %183, %cst_112 {dimension_numbers = #tpu.dot_dimension_numbers<[1], [0], [0], [1], [0, 0, 1, 1], [], []>} : vector<16x32xf32>, vector<32x32xf32>, vector<16x32xf32> -> vector<16x32xf32>
      %c0_113 = arith.constant 0 : index
      %c0_114 = arith.constant 0 : index
      %185 = vector.load %arg11[%c0_113, %c0_114] : memref<1x32xf32, #tpu.memory_space<vmem>>, vector<1x32xf32>
      %186 = vector.broadcast %185 : vector<1x32xf32> to vector<16x32xf32>
      %187 = arith.addf %184, %186 : vector<16x32xf32>
      %c0_115 = arith.constant 0 : index
      %c0_116 = arith.constant 0 : index
      %188 = vector.load %arg15[%c0_115, %c0_116] : memref<16x32xf32, #tpu.memory_space<vmem>>, vector<16x32xf32>
      tpu.vector_store %arg15[%c0_115, %c0_116], %182 {strides = array<i32>} : memref<16x32xf32, #tpu.memory_space<vmem>>, vector<16x32xf32>,
      %c0_117 = arith.constant 0 : index
      %c0_118 = arith.constant 0 : index
      %189 = vector.load %arg16[%c0_117, %c0_118] : memref<16x32xf32, #tpu.memory_space<vmem>>, vector<16x32xf32>
      tpu.vector_store %arg16[%c0_117, %c0_118], %187 {strides = array<i32>} : memref<16x32xf32, #tpu.memory_space<vmem>>, vector<16x32xf32>,
    } else {
    }
    %c0 = arith.constant 0 : index
    %c0_1 = arith.constant 0 : index
    %c0_2 = arith.constant 0 : index
    %3 = vector.load %arg2[%c0, %c0_1, %c0_2] : memref<2x8x32xf32, #tpu.memory_space<vmem>>, vector<2x8x32xf32>
    %4 = vector.shape_cast %3 : vector<2x8x32xf32> to vector<16x32xf32>
    %c0_3 = arith.constant 0 : index
    %c0_4 = arith.constant 0 : index
    %5 = vector.load %arg6[%c0_3, %c0_4] : memref<32x32xf32, #tpu.memory_space<vmem>>, vector<32x32xf32>
    %cst = arith.constant dense<0.000000e+00> : vector<16x32xf32>
    %6 = tpu.matmul %4, %5, %cst {dimension_numbers = #tpu.dot_dimension_numbers<[1], [0], [0], [1], [0, 0, 1, 1], [], []>} : vector<16x32xf32>, vector<32x32xf32>, vector<16x32xf32> -> vector<16x32xf32>
    %c0_5 = arith.constant 0 : index
    %c0_6 = arith.constant 0 : index
    %7 = vector.load %arg7[%c0_5, %c0_6] : memref<1x32xf32, #tpu.memory_space<vmem>>, vector<1x32xf32>
    %8 = vector.broadcast %7 : vector<1x32xf32> to vector<16x32xf32>
    %9 = arith.addf %6, %8 : vector<16x32xf32>
    %c0_7 = arith.constant 0 : index
    %c0_8 = arith.constant 0 : index
    %10 = vector.load %arg15[%c0_7, %c0_8] : memref<16x32xf32, #tpu.memory_space<vmem>>, vector<8x32xf32>
    %c0_9 = arith.constant 0 : index
    %c0_10 = arith.constant 0 : index
    %11 = vector.load %arg16[%c0_9, %c0_10] : memref<16x32xf32, #tpu.memory_space<vmem>>, vector<8x32xf32>
    %12 = vector.extract_strided_slice %9 {offsets = [0, 0], sizes = [8, 8], strides = [1, 1]} : vector<16x32xf32> to vector<8x8xf32>
    %13 = vector.extract_strided_slice %10 {offsets = [0, 0], sizes = [8, 8], strides = [1, 1]} : vector<8x32xf32> to vector<8x8xf32>
    %14 = vector.extract_strided_slice %11 {offsets = [0, 0], sizes = [8, 8], strides = [1, 1]} : vector<8x32xf32> to vector<8x8xf32>
    %cst_11 = arith.constant dense<0.000000e+00> : vector<8x8xf32>
    %15 = tpu.matmul %12, %13, %cst_11 {dimension_numbers = #tpu.dot_dimension_numbers<[1], [1], [0], [0], [0, 0, 1, 0], [], []>} : vector<8x8xf32>, vector<8x8xf32>, vector<8x8xf32> -> vector<8x8xf32>
    %c0_12 = arith.constant 0 : index
    %c0_13 = arith.constant 0 : index
    %c0_14 = arith.constant 0 : index
    %c0_15 = arith.constant 0 : index
    %16 = vector.load %arg5[%c0_12, %c0_13, %c0_14, %c0_15] : memref<2x4x8x8xf32, #tpu.memory_space<vmem>>, vector<1x1x8x8xf32>
    %17 = vector.shape_cast %16 : vector<1x1x8x8xf32> to vector<8x8xf32>
    %18 = arith.addf %15, %17 : vector<8x8xf32>
    %cst_16 = arith.constant dense<0xFF800000> : vector<8xf32>
    %19 = vector.multi_reduction <maximumf>, %18, %cst_16 [1] : vector<8x8xf32> to vector<8xf32>
    %20 = vector.shape_cast %19 : vector<8xf32> to vector<8x1xf32>
    %21 = vector.broadcast %20 : vector<8x1xf32> to vector<8x8xf32>
    %22 = arith.subf %18, %21 : vector<8x8xf32>
    %23 = math.exp %22 : vector<8x8xf32>
    %cst_17 = arith.constant dense<0.000000e+00> : vector<8xf32>
    %24 = vector.multi_reduction <add>, %23, %cst_17 [1] : vector<8x8xf32> to vector<8xf32>
    %25 = vector.shape_cast %24 : vector<8xf32> to vector<8x1xf32>
    %cst_18 = arith.constant dense<0.000000e+00> : vector<8x8xf32>
    %26 = tpu.matmul %23, %14, %cst_18 {dimension_numbers = #tpu.dot_dimension_numbers<[1], [0], [0], [1], [0, 0, 1, 1], [], []>} : vector<8x8xf32>, vector<8x8xf32>, vector<8x8xf32> -> vector<8x8xf32>
    %27 = tpu.reciprocal %25 : vector<8x1xf32> -> vector<8x1xf32>
    %28 = vector.broadcast %27 : vector<8x1xf32> to vector<8x8xf32>
    %29 = arith.mulf %26, %28 : vector<8x8xf32>
    %c0_19 = arith.constant 0 : index
    %c0_20 = arith.constant 0 : index
    %30 = vector.load %arg17[%c0_19, %c0_20] : memref<16x32xf32, #tpu.memory_space<vmem>>, vector<8x8xf32>
    tpu.vector_store %arg17[%c0_19, %c0_20], %29 {strides = array<i32>} : memref<16x32xf32, #tpu.memory_space<vmem>>, vector<8x8xf32>,
    %31 = vector.extract_strided_slice %9 {offsets = [0, 8], sizes = [8, 8], strides = [1, 1]} : vector<16x32xf32> to vector<8x8xf32>
    %32 = vector.extract_strided_slice %10 {offsets = [0, 8], sizes = [8, 8], strides = [1, 1]} : vector<8x32xf32> to vector<8x8xf32>
    %33 = vector.extract_strided_slice %11 {offsets = [0, 8], sizes = [8, 8], strides = [1, 1]} : vector<8x32xf32> to vector<8x8xf32>
    %cst_21 = arith.constant dense<0.000000e+00> : vector<8x8xf32>
    %34 = tpu.matmul %31, %32, %cst_21 {dimension_numbers = #tpu.dot_dimension_numbers<[1], [1], [0], [0], [0, 0, 1, 0], [], []>} : vector<8x8xf32>, vector<8x8xf32>, vector<8x8xf32> -> vector<8x8xf32>
    %c0_22 = arith.constant 0 : index
    %c1 = arith.constant 1 : index
    %c0_23 = arith.constant 0 : index
    %c0_24 = arith.constant 0 : index
    %35 = vector.load %arg5[%c0_22, %c1, %c0_23, %c0_24] : memref<2x4x8x8xf32, #tpu.memory_space<vmem>>, vector<1x1x8x8xf32>
    %36 = vector.shape_cast %35 : vector<1x1x8x8xf32> to vector<8x8xf32>
    %37 = arith.addf %34, %36 : vector<8x8xf32>
    %cst_25 = arith.constant dense<0xFF800000> : vector<8xf32>
    %38 = vector.multi_reduction <maximumf>, %37, %cst_25 [1] : vector<8x8xf32> to vector<8xf32>
    %39 = vector.shape_cast %38 : vector<8xf32> to vector<8x1xf32>
    %40 = vector.broadcast %39 : vector<8x1xf32> to vector<8x8xf32>
    %41 = arith.subf %37, %40 : vector<8x8xf32>
    %42 = math.exp %41 : vector<8x8xf32>
    %cst_26 = arith.constant dense<0.000000e+00> : vector<8xf32>
    %43 = vector.multi_reduction <add>, %42, %cst_26 [1] : vector<8x8xf32> to vector<8xf32>
    %44 = vector.shape_cast %43 : vector<8xf32> to vector<8x1xf32>
    %cst_27 = arith.constant dense<0.000000e+00> : vector<8x8xf32>
    %45 = tpu.matmul %42, %33, %cst_27 {dimension_numbers = #tpu.dot_dimension_numbers<[1], [0], [0], [1], [0, 0, 1, 1], [], []>} : vector<8x8xf32>, vector<8x8xf32>, vector<8x8xf32> -> vector<8x8xf32>
    %46 = tpu.reciprocal %44 : vector<8x1xf32> -> vector<8x1xf32>
    %47 = vector.broadcast %46 : vector<8x1xf32> to vector<8x8xf32>
    %48 = arith.mulf %45, %47 : vector<8x8xf32>
    %c0_28 = arith.constant 0 : index
    %c8 = arith.constant 8 : index
    %49 = vector.load %arg17[%c0_28, %c8] : memref<16x32xf32, #tpu.memory_space<vmem>>, vector<8x8xf32>
    tpu.vector_store %arg17[%c0_28, %c8], %48 {strides = array<i32>} : memref<16x32xf32, #tpu.memory_space<vmem>>, vector<8x8xf32>,
    %50 = vector.extract_strided_slice %9 {offsets = [0, 16], sizes = [8, 8], strides = [1, 1]} : vector<16x32xf32> to vector<8x8xf32>
    %51 = vector.extract_strided_slice %10 {offsets = [0, 16], sizes = [8, 8], strides = [1, 1]} : vector<8x32xf32> to vector<8x8xf32>
    %52 = vector.extract_strided_slice %11 {offsets = [0, 16], sizes = [8, 8], strides = [1, 1]} : vector<8x32xf32> to vector<8x8xf32>
    %cst_29 = arith.constant dense<0.000000e+00> : vector<8x8xf32>
    %53 = tpu.matmul %50, %51, %cst_29 {dimension_numbers = #tpu.dot_dimension_numbers<[1], [1], [0], [0], [0, 0, 1, 0], [], []>} : vector<8x8xf32>, vector<8x8xf32>, vector<8x8xf32> -> vector<8x8xf32>
    %c0_30 = arith.constant 0 : index
    %c2 = arith.constant 2 : index
    %c0_31 = arith.constant 0 : index
    %c0_32 = arith.constant 0 : index
    %54 = vector.load %arg5[%c0_30, %c2, %c0_31, %c0_32] : memref<2x4x8x8xf32, #tpu.memory_space<vmem>>, vector<1x1x8x8xf32>
    %55 = vector.shape_cast %54 : vector<1x1x8x8xf32> to vector<8x8xf32>
    %56 = arith.addf %53, %55 : vector<8x8xf32>
    %cst_33 = arith.constant dense<0xFF800000> : vector<8xf32>
    %57 = vector.multi_reduction <maximumf>, %56, %cst_33 [1] : vector<8x8xf32> to vector<8xf32>
    %58 = vector.shape_cast %57 : vector<8xf32> to vector<8x1xf32>
    %59 = vector.broadcast %58 : vector<8x1xf32> to vector<8x8xf32>
    %60 = arith.subf %56, %59 : vector<8x8xf32>
    %61 = math.exp %60 : vector<8x8xf32>
    %cst_34 = arith.constant dense<0.000000e+00> : vector<8xf32>
    %62 = vector.multi_reduction <add>, %61, %cst_34 [1] : vector<8x8xf32> to vector<8xf32>
    %63 = vector.shape_cast %62 : vector<8xf32> to vector<8x1xf32>
    %cst_35 = arith.constant dense<0.000000e+00> : vector<8x8xf32>
    %64 = tpu.matmul %61, %52, %cst_35 {dimension_numbers = #tpu.dot_dimension_numbers<[1], [0], [0], [1], [0, 0, 1, 1], [], []>} : vector<8x8xf32>, vector<8x8xf32>, vector<8x8xf32> -> vector<8x8xf32>
    %65 = tpu.reciprocal %63 : vector<8x1xf32> -> vector<8x1xf32>
    %66 = vector.broadcast %65 : vector<8x1xf32> to vector<8x8xf32>
    %67 = arith.mulf %64, %66 : vector<8x8xf32>
    %c0_36 = arith.constant 0 : index
    %c16 = arith.constant 16 : index
    %68 = vector.load %arg17[%c0_36, %c16] : memref<16x32xf32, #tpu.memory_space<vmem>>, vector<8x8xf32>
    tpu.vector_store %arg17[%c0_36, %c16], %67 {strides = array<i32>} : memref<16x32xf32, #tpu.memory_space<vmem>>, vector<8x8xf32>,
    %69 = vector.extract_strided_slice %9 {offsets = [0, 24], sizes = [8, 8], strides = [1, 1]} : vector<16x32xf32> to vector<8x8xf32>
    %70 = vector.extract_strided_slice %10 {offsets = [0, 24], sizes = [8, 8], strides = [1, 1]} : vector<8x32xf32> to vector<8x8xf32>
    %71 = vector.extract_strided_slice %11 {offsets = [0, 24], sizes = [8, 8], strides = [1, 1]} : vector<8x32xf32> to vector<8x8xf32>
    %cst_37 = arith.constant dense<0.000000e+00> : vector<8x8xf32>
    %72 = tpu.matmul %69, %70, %cst_37 {dimension_numbers = #tpu.dot_dimension_numbers<[1], [1], [0], [0], [0, 0, 1, 0], [], []>} : vector<8x8xf32>, vector<8x8xf32>, vector<8x8xf32> -> vector<8x8xf32>
    %c0_38 = arith.constant 0 : index
    %c3 = arith.constant 3 : index
    %c0_39 = arith.constant 0 : index
    %c0_40 = arith.constant 0 : index
    %73 = vector.load %arg5[%c0_38, %c3, %c0_39, %c0_40] : memref<2x4x8x8xf32, #tpu.memory_space<vmem>>, vector<1x1x8x8xf32>
    %74 = vector.shape_cast %73 : vector<1x1x8x8xf32> to vector<8x8xf32>
    %75 = arith.addf %72, %74 : vector<8x8xf32>
    %cst_41 = arith.constant dense<0xFF800000> : vector<8xf32>
    %76 = vector.multi_reduction <maximumf>, %75, %cst_41 [1] : vector<8x8xf32> to vector<8xf32>
    %77 = vector.shape_cast %76 : vector<8xf32> to vector<8x1xf32>
    %78 = vector.broadcast %77 : vector<8x1xf32> to vector<8x8xf32>
    %79 = arith.subf %75, %78 : vector<8x8xf32>
    %80 = math.exp %79 : vector<8x8xf32>
    %cst_42 = arith.constant dense<0.000000e+00> : vector<8xf32>
    %81 = vector.multi_reduction <add>, %80, %cst_42 [1] : vector<8x8xf32> to vector<8xf32>
    %82 = vector.shape_cast %81 : vector<8xf32> to vector<8x1xf32>
    %cst_43 = arith.constant dense<0.000000e+00> : vector<8x8xf32>
    %83 = tpu.matmul %80, %71, %cst_43 {dimension_numbers = #tpu.dot_dimension_numbers<[1], [0], [0], [1], [0, 0, 1, 1], [], []>} : vector<8x8xf32>, vector<8x8xf32>, vector<8x8xf32> -> vector<8x8xf32>
    %84 = tpu.reciprocal %82 : vector<8x1xf32> -> vector<8x1xf32>
    %85 = vector.broadcast %84 : vector<8x1xf32> to vector<8x8xf32>
    %86 = arith.mulf %83, %85 : vector<8x8xf32>
    %c0_44 = arith.constant 0 : index
    %c24 = arith.constant 24 : index
    %87 = vector.load %arg17[%c0_44, %c24] : memref<16x32xf32, #tpu.memory_space<vmem>>, vector<8x8xf32>
    tpu.vector_store %arg17[%c0_44, %c24], %86 {strides = array<i32>} : memref<16x32xf32, #tpu.memory_space<vmem>>, vector<8x8xf32>,
    %c8_45 = arith.constant 8 : index
    %c0_46 = arith.constant 0 : index
    %88 = vector.load %arg15[%c8_45, %c0_46] : memref<16x32xf32, #tpu.memory_space<vmem>>, vector<8x32xf32>
    %c8_47 = arith.constant 8 : index
    %c0_48 = arith.constant 0 : index
    %89 = vector.load %arg16[%c8_47, %c0_48] : memref<16x32xf32, #tpu.memory_space<vmem>>, vector<8x32xf32>
    %90 = vector.extract_strided_slice %9 {offsets = [8, 0], sizes = [8, 8], strides = [1, 1]} : vector<16x32xf32> to vector<8x8xf32>
    %91 = vector.extract_strided_slice %88 {offsets = [0, 0], sizes = [8, 8], strides = [1, 1]} : vector<8x32xf32> to vector<8x8xf32>
    %92 = vector.extract_strided_slice %89 {offsets = [0, 0], sizes = [8, 8], strides = [1, 1]} : vector<8x32xf32> to vector<8x8xf32>
    %cst_49 = arith.constant dense<0.000000e+00> : vector<8x8xf32>
    %93 = tpu.matmul %90, %91, %cst_49 {dimension_numbers = #tpu.dot_dimension_numbers<[1], [1], [0], [0], [0, 0, 1, 0], [], []>} : vector<8x8xf32>, vector<8x8xf32>, vector<8x8xf32> -> vector<8x8xf32>
    %c1_50 = arith.constant 1 : index
    %c0_51 = arith.constant 0 : index
    %c0_52 = arith.constant 0 : index
    %c0_53 = arith.constant 0 : index
    %94 = vector.load %arg5[%c1_50, %c0_51, %c0_52, %c0_53] : memref<2x4x8x8xf32, #tpu.memory_space<vmem>>, vector<1x1x8x8xf32>
    %95 = vector.shape_cast %94 : vector<1x1x8x8xf32> to vector<8x8xf32>
    %96 = arith.addf %93, %95 : vector<8x8xf32>
    %cst_54 = arith.constant dense<0xFF800000> : vector<8xf32>
    %97 = vector.multi_reduction <maximumf>, %96, %cst_54 [1] : vector<8x8xf32> to vector<8xf32>
    %98 = vector.shape_cast %97 : vector<8xf32> to vector<8x1xf32>
    %99 = vector.broadcast %98 : vector<8x1xf32> to vector<8x8xf32>
    %100 = arith.subf %96, %99 : vector<8x8xf32>
    %101 = math.exp %100 : vector<8x8xf32>
    %cst_55 = arith.constant dense<0.000000e+00> : vector<8xf32>
    %102 = vector.multi_reduction <add>, %101, %cst_55 [1] : vector<8x8xf32> to vector<8xf32>
    %103 = vector.shape_cast %102 : vector<8xf32> to vector<8x1xf32>
    %cst_56 = arith.constant dense<0.000000e+00> : vector<8x8xf32>
    %104 = tpu.matmul %101, %92, %cst_56 {dimension_numbers = #tpu.dot_dimension_numbers<[1], [0], [0], [1], [0, 0, 1, 1], [], []>} : vector<8x8xf32>, vector<8x8xf32>, vector<8x8xf32> -> vector<8x8xf32>
    %105 = tpu.reciprocal %103 : vector<8x1xf32> -> vector<8x1xf32>
    %106 = vector.broadcast %105 : vector<8x1xf32> to vector<8x8xf32>
    %107 = arith.mulf %104, %106 : vector<8x8xf32>
    %c8_57 = arith.constant 8 : index
    %c0_58 = arith.constant 0 : index
    %108 = vector.load %arg17[%c8_57, %c0_58] : memref<16x32xf32, #tpu.memory_space<vmem>>, vector<8x8xf32>
    tpu.vector_store %arg17[%c8_57, %c0_58], %107 {strides = array<i32>} : memref<16x32xf32, #tpu.memory_space<vmem>>, vector<8x8xf32>,
    %109 = vector.extract_strided_slice %9 {offsets = [8, 8], sizes = [8, 8], strides = [1, 1]} : vector<16x32xf32> to vector<8x8xf32>
    %110 = vector.extract_strided_slice %88 {offsets = [0, 8], sizes = [8, 8], strides = [1, 1]} : vector<8x32xf32> to vector<8x8xf32>
    %111 = vector.extract_strided_slice %89 {offsets = [0, 8], sizes = [8, 8], strides = [1, 1]} : vector<8x32xf32> to vector<8x8xf32>
    %cst_59 = arith.constant dense<0.000000e+00> : vector<8x8xf32>
    %112 = tpu.matmul %109, %110, %cst_59 {dimension_numbers = #tpu.dot_dimension_numbers<[1], [1], [0], [0], [0, 0, 1, 0], [], []>} : vector<8x8xf32>, vector<8x8xf32>, vector<8x8xf32> -> vector<8x8xf32>
    %c1_60 = arith.constant 1 : index
    %c1_61 = arith.constant 1 : index
    %c0_62 = arith.constant 0 : index
    %c0_63 = arith.constant 0 : index
    %113 = vector.load %arg5[%c1_60, %c1_61, %c0_62, %c0_63] : memref<2x4x8x8xf32, #tpu.memory_space<vmem>>, vector<1x1x8x8xf32>
    %114 = vector.shape_cast %113 : vector<1x1x8x8xf32> to vector<8x8xf32>
    %115 = arith.addf %112, %114 : vector<8x8xf32>
    %cst_64 = arith.constant dense<0xFF800000> : vector<8xf32>
    %116 = vector.multi_reduction <maximumf>, %115, %cst_64 [1] : vector<8x8xf32> to vector<8xf32>
    %117 = vector.shape_cast %116 : vector<8xf32> to vector<8x1xf32>
    %118 = vector.broadcast %117 : vector<8x1xf32> to vector<8x8xf32>
    %119 = arith.subf %115, %118 : vector<8x8xf32>
    %120 = math.exp %119 : vector<8x8xf32>
    %cst_65 = arith.constant dense<0.000000e+00> : vector<8xf32>
    %121 = vector.multi_reduction <add>, %120, %cst_65 [1] : vector<8x8xf32> to vector<8xf32>
    %122 = vector.shape_cast %121 : vector<8xf32> to vector<8x1xf32>
    %cst_66 = arith.constant dense<0.000000e+00> : vector<8x8xf32>
    %123 = tpu.matmul %120, %111, %cst_66 {dimension_numbers = #tpu.dot_dimension_numbers<[1], [0], [0], [1], [0, 0, 1, 1], [], []>} : vector<8x8xf32>, vector<8x8xf32>, vector<8x8xf32> -> vector<8x8xf32>
    %124 = tpu.reciprocal %122 : vector<8x1xf32> -> vector<8x1xf32>
    %125 = vector.broadcast %124 : vector<8x1xf32> to vector<8x8xf32>
    %126 = arith.mulf %123, %125 : vector<8x8xf32>
    %c8_67 = arith.constant 8 : index
    %c8_68 = arith.constant 8 : index
    %127 = vector.load %arg17[%c8_67, %c8_68] : memref<16x32xf32, #tpu.memory_space<vmem>>, vector<8x8xf32>
    tpu.vector_store %arg17[%c8_67, %c8_68], %126 {strides = array<i32>} : memref<16x32xf32, #tpu.memory_space<vmem>>, vector<8x8xf32>,
    %128 = vector.extract_strided_slice %9 {offsets = [8, 16], sizes = [8, 8], strides = [1, 1]} : vector<16x32xf32> to vector<8x8xf32>
    %129 = vector.extract_strided_slice %88 {offsets = [0, 16], sizes = [8, 8], strides = [1, 1]} : vector<8x32xf32> to vector<8x8xf32>
    %130 = vector.extract_strided_slice %89 {offsets = [0, 16], sizes = [8, 8], strides = [1, 1]} : vector<8x32xf32> to vector<8x8xf32>
    %cst_69 = arith.constant dense<0.000000e+00> : vector<8x8xf32>
    %131 = tpu.matmul %128, %129, %cst_69 {dimension_numbers = #tpu.dot_dimension_numbers<[1], [1], [0], [0], [0, 0, 1, 0], [], []>} : vector<8x8xf32>, vector<8x8xf32>, vector<8x8xf32> -> vector<8x8xf32>
    %c1_70 = arith.constant 1 : index
    %c2_71 = arith.constant 2 : index
    %c0_72 = arith.constant 0 : index
    %c0_73 = arith.constant 0 : index
    %132 = vector.load %arg5[%c1_70, %c2_71, %c0_72, %c0_73] : memref<2x4x8x8xf32, #tpu.memory_space<vmem>>, vector<1x1x8x8xf32>
    %133 = vector.shape_cast %132 : vector<1x1x8x8xf32> to vector<8x8xf32>
    %134 = arith.addf %131, %133 : vector<8x8xf32>
    %cst_74 = arith.constant dense<0xFF800000> : vector<8xf32>
    %135 = vector.multi_reduction <maximumf>, %134, %cst_74 [1] : vector<8x8xf32> to vector<8xf32>
    %136 = vector.shape_cast %135 : vector<8xf32> to vector<8x1xf32>
    %137 = vector.broadcast %136 : vector<8x1xf32> to vector<8x8xf32>
    %138 = arith.subf %134, %137 : vector<8x8xf32>
    %139 = math.exp %138 : vector<8x8xf32>
    %cst_75 = arith.constant dense<0.000000e+00> : vector<8xf32>
    %140 = vector.multi_reduction <add>, %139, %cst_75 [1] : vector<8x8xf32> to vector<8xf32>
    %141 = vector.shape_cast %140 : vector<8xf32> to vector<8x1xf32>
    %cst_76 = arith.constant dense<0.000000e+00> : vector<8x8xf32>
    %142 = tpu.matmul %139, %130, %cst_76 {dimension_numbers = #tpu.dot_dimension_numbers<[1], [0], [0], [1], [0, 0, 1, 1], [], []>} : vector<8x8xf32>, vector<8x8xf32>, vector<8x8xf32> -> vector<8x8xf32>
    %143 = tpu.reciprocal %141 : vector<8x1xf32> -> vector<8x1xf32>
    %144 = vector.broadcast %143 : vector<8x1xf32> to vector<8x8xf32>
    %145 = arith.mulf %142, %144 : vector<8x8xf32>
    %c8_77 = arith.constant 8 : index
    %c16_78 = arith.constant 16 : index
    %146 = vector.load %arg17[%c8_77, %c16_78] : memref<16x32xf32, #tpu.memory_space<vmem>>, vector<8x8xf32>
    tpu.vector_store %arg17[%c8_77, %c16_78], %145 {strides = array<i32>} : memref<16x32xf32, #tpu.memory_space<vmem>>, vector<8x8xf32>,
    %147 = vector.extract_strided_slice %9 {offsets = [8, 24], sizes = [8, 8], strides = [1, 1]} : vector<16x32xf32> to vector<8x8xf32>
    %148 = vector.extract_strided_slice %88 {offsets = [0, 24], sizes = [8, 8], strides = [1, 1]} : vector<8x32xf32> to vector<8x8xf32>
    %149 = vector.extract_strided_slice %89 {offsets = [0, 24], sizes = [8, 8], strides = [1, 1]} : vector<8x32xf32> to vector<8x8xf32>
    %cst_79 = arith.constant dense<0.000000e+00> : vector<8x8xf32>
    %150 = tpu.matmul %147, %148, %cst_79 {dimension_numbers = #tpu.dot_dimension_numbers<[1], [1], [0], [0], [0, 0, 1, 0], [], []>} : vector<8x8xf32>, vector<8x8xf32>, vector<8x8xf32> -> vector<8x8xf32>
    %c1_80 = arith.constant 1 : index
    %c3_81 = arith.constant 3 : index
    %c0_82 = arith.constant 0 : index
    %c0_83 = arith.constant 0 : index
    %151 = vector.load %arg5[%c1_80, %c3_81, %c0_82, %c0_83] : memref<2x4x8x8xf32, #tpu.memory_space<vmem>>, vector<1x1x8x8xf32>
    %152 = vector.shape_cast %151 : vector<1x1x8x8xf32> to vector<8x8xf32>
    %153 = arith.addf %150, %152 : vector<8x8xf32>
    %cst_84 = arith.constant dense<0xFF800000> : vector<8xf32>
    %154 = vector.multi_reduction <maximumf>, %153, %cst_84 [1] : vector<8x8xf32> to vector<8xf32>
    %155 = vector.shape_cast %154 : vector<8xf32> to vector<8x1xf32>
    %156 = vector.broadcast %155 : vector<8x1xf32> to vector<8x8xf32>
    %157 = arith.subf %153, %156 : vector<8x8xf32>
    %158 = math.exp %157 : vector<8x8xf32>
    %cst_85 = arith.constant dense<0.000000e+00> : vector<8xf32>
    %159 = vector.multi_reduction <add>, %158, %cst_85 [1] : vector<8x8xf32> to vector<8xf32>
    %160 = vector.shape_cast %159 : vector<8xf32> to vector<8x1xf32>
    %cst_86 = arith.constant dense<0.000000e+00> : vector<8x8xf32>
    %161 = tpu.matmul %158, %149, %cst_86 {dimension_numbers = #tpu.dot_dimension_numbers<[1], [0], [0], [1], [0, 0, 1, 1], [], []>} : vector<8x8xf32>, vector<8x8xf32>, vector<8x8xf32> -> vector<8x8xf32>
    %162 = tpu.reciprocal %160 : vector<8x1xf32> -> vector<8x1xf32>
    %163 = vector.broadcast %162 : vector<8x1xf32> to vector<8x8xf32>
    %164 = arith.mulf %161, %163 : vector<8x8xf32>
    %c8_87 = arith.constant 8 : index
    %c24_88 = arith.constant 24 : index
    %165 = vector.load %arg17[%c8_87, %c24_88] : memref<16x32xf32, #tpu.memory_space<vmem>>, vector<8x8xf32>
    tpu.vector_store %arg17[%c8_87, %c24_88], %164 {strides = array<i32>} : memref<16x32xf32, #tpu.memory_space<vmem>>, vector<8x8xf32>,
    %c0_89 = arith.constant 0 : index
    %c0_90 = arith.constant 0 : index
    %166 = vector.load %arg17[%c0_89, %c0_90] : memref<16x32xf32, #tpu.memory_space<vmem>>, vector<16x32xf32>
    %c0_91 = arith.constant 0 : index
    %c0_92 = arith.constant 0 : index
    %167 = vector.load %arg12[%c0_91, %c0_92] : memref<32x32xf32, #tpu.memory_space<vmem>>, vector<32x32xf32>
    %cst_93 = arith.constant dense<0.000000e+00> : vector<16x32xf32>
    %168 = tpu.matmul %166, %167, %cst_93 {dimension_numbers = #tpu.dot_dimension_numbers<[1], [0], [0], [1], [0, 0, 1, 1], [], []>} : vector<16x32xf32>, vector<32x32xf32>, vector<16x32xf32> -> vector<16x32xf32>
    %c0_94 = arith.constant 0 : index
    %c0_95 = arith.constant 0 : index
    %169 = vector.load %arg13[%c0_94, %c0_95] : memref<1x32xf32, #tpu.memory_space<vmem>>, vector<1x32xf32>
    %170 = vector.broadcast %169 : vector<1x32xf32> to vector<16x32xf32>
    %171 = arith.addf %168, %170 : vector<16x32xf32>
    %172 = vector.shape_cast %171 : vector<16x32xf32> to vector<2x8x32xf32>
    %c0_96 = arith.constant 0 : index
    %c0_97 = arith.constant 0 : index
    %c0_98 = arith.constant 0 : index
    %173 = vector.load %arg14[%c0_96, %c0_97, %c0_98] : memref<2x8x32xf32, #tpu.memory_space<vmem>>, vector<2x8x32xf32>
    tpu.vector_store %arg14[%c0_96, %c0_97, %c0_98], %172 {strides = array<i32>} : memref<2x8x32xf32, #tpu.memory_space<vmem>>, vector<2x8x32xf32>,
    return
  }
  func.func @transform_0(%arg0: i32, %arg1: i32) -> (i32, i32, i32) {
    %c0_i32 = arith.constant 0 : i32
    %c0_i32_0 = arith.constant 0 : i32
    return %arg0, %arg1, %c0_i32 : i32, i32, i32
  }
  func.func @transform_1(%arg0: i32, %arg1: i32) -> (i32, i32, i32) {
    %c0_i32 = arith.constant 0 : i32
    %c0_i32_0 = arith.constant 0 : i32
    %c0_i32_1 = arith.constant 0 : i32
    return %arg0, %c0_i32, %c0_i32_0 : i32, i32, i32
  }
  func.func @transform_2(%arg0: i32, %arg1: i32) -> (i32, i32, i32) {
    %c0_i32 = arith.constant 0 : i32
    %c0_i32_0 = arith.constant 0 : i32
    %c0_i32_1 = arith.constant 0 : i32
    return %arg0, %c0_i32, %c0_i32_0 : i32, i32, i32
  }
  func.func @transform_3(%arg0: i32, %arg1: i32) -> (i32, i32, i32, i32) {
    %c0_i32 = arith.constant 0 : i32
    %c0_i32_0 = arith.constant 0 : i32
    %c0_i32_1 = arith.constant 0 : i32
    return %arg0, %c0_i32, %arg1, %c0_i32_0 : i32, i32, i32, i32
  }
  func.func @transform_4(%arg0: i32, %arg1: i32) -> (i32, i32) {
    %c0_i32 = arith.constant 0 : i32
    %c0_i32_0 = arith.constant 0 : i32
    %c0_i32_1 = arith.constant 0 : i32
    return %c0_i32, %c0_i32_0 : i32, i32
  }
  func.func @transform_5(%arg0: i32, %arg1: i32) -> (i32, i32) {
    %c0_i32 = arith.constant 0 : i32
    %c0_i32_0 = arith.constant 0 : i32
    %c0_i32_1 = arith.constant 0 : i32
    return %c0_i32, %c0_i32_0 : i32, i32
  }
  func.func @transform_6(%arg0: i32, %arg1: i32) -> (i32, i32) {
    %c0_i32 = arith.constant 0 : i32
    %c0_i32_0 = arith.constant 0 : i32
    %c0_i32_1 = arith.constant 0 : i32
    return %c0_i32, %c0_i32_0 : i32, i32
  }
  func.func @transform_7(%arg0: i32, %arg1: i32) -> (i32, i32) {
    %c0_i32 = arith.constant 0 : i32
    %c0_i32_0 = arith.constant 0 : i32
    %c0_i32_1 = arith.constant 0 : i32
    return %c0_i32, %c0_i32_0 : i32, i32
  }
  func.func @transform_8(%arg0: i32, %arg1: i32) -> (i32, i32) {
    %c0_i32 = arith.constant 0 : i32
    %c0_i32_0 = arith.constant 0 : i32
    %c0_i32_1 = arith.constant 0 : i32
    return %c0_i32, %c0_i32_0 : i32, i32
  }
  func.func @transform_9(%arg0: i32, %arg1: i32) -> (i32, i32) {
    %c0_i32 = arith.constant 0 : i32
    %c0_i32_0 = arith.constant 0 : i32
    %c0_i32_1 = arith.constant 0 : i32
    return %c0_i32, %c0_i32_0 : i32, i32
  }
  func.func @transform_10(%arg0: i32, %arg1: i32) -> (i32, i32) {
    %c0_i32 = arith.constant 0 : i32
    %c0_i32_0 = arith.constant 0 : i32
    %c0_i32_1 = arith.constant 0 : i32
    return %c0_i32, %c0_i32_0 : i32, i32
  }
  func.func @transform_11(%arg0: i32, %arg1: i32) -> (i32, i32) {
    %c0_i32 = arith.constant 0 : i32
    %c0_i32_0 = arith.constant 0 : i32
    %c0_i32_1 = arith.constant 0 : i32
    return %c0_i32, %c0_i32_0 : i32, i32
  }
  func.func @transform_12(%arg0: i32, %arg1: i32) -> (i32, i32, i32) {
    %c0_i32 = arith.constant 0 : i32
    %c0_i32_0 = arith.constant 0 : i32
    return %arg0, %arg1, %c0_i32 : i32, i32, i32
  }
}

</mosaic_0001>

<bundles_post_ra>
// kernel: multi_head_attention.1
= control target key start
LH: loop header
LB: loop body
LE: loop exit
PB: predicated region body
PF: predicated region fallthrough
CT: control target
= control target key end

     0   :  { %17 = vsyncpa [#allocation6], 0  ;;  %s2690_s0 = inlined_call_operand.vmem [shape: f32[2,8,32], index: 0, kind: input, shape index: {}]   ;;  %s2691_s1 = inlined_call_operand.hbm [shape: f32[2,8,32], index: 1, kind: input, shape index: {}]   ;;  %s2692_s2 = inlined_call_operand.hbm [shape: f32[2,8,32], index: 2, kind: input, shape index: {}]   ;;  %s2693_s3 = inlined_call_operand.vmem [shape: f32[2,4,8,8], index: 3, kind: input, shape index: {}]   ;;  %s2694_s4 = inlined_call_operand.vmem [shape: f32[32,32], index: 4, kind: input, shape index: {}]   ;;  %s2695_s5 = inlined_call_operand.vmem [shape: f32[1,32], index: 5, kind: input, shape index: {}]   ;;  %s2696_s6 = inlined_call_operand.vmem [shape: f32[32,32], index: 6, kind: input, shape index: {}]   ;;  %s2697_s7 = inlined_call_operand.vmem [shape: f32[1,32], index: 7, kind: input, shape index: {}]   ;;  %s2698_s8 = inlined_call_operand.hbm [shape: f32[32,32], index: 8, kind: input, shape index: {}]   ;;  %s2699_s9 = inlined_call_operand.vmem [shape: f32[1,32], index: 9, kind: input, shape index: {}]   ;;  %s2700_s10 = inlined_call_operand.hbm [shape: f32[32,32], index: 10, kind: input, shape index: {}]   ;;  %s2701_s11 = inlined_call_operand.vmem [shape: f32[1,32], index: 11, kind: input, shape index: {}]   ;;  %s2702_s12 = inlined_call_operand.hbm [shape: f32[2,8,32], index: 12, kind: output, shape index: {}]  }
   0x1   :  { %18 = vsyncpa [#allocation9], 0 }
   0x2   :  { %19 = vsyncpa [#allocation12], 0 }
   0x3   :  { %20 = vsyncpa [#allocation7], 0  ;;  %s2290_s21 = smov [#allocation8]   ;;  %s2291_s23 = smov [#allocation5]  }
   0x4   :  { %s40_s22 = sshll.u32 %s2290_s21, 4  ;;  %s28_s24 = sshll.u32 %s2291_s23, 4  ;;  %s41_s22 = int_to_ptr.vmem [resolvable:$true] %s40_s22  ;;  %s2369_s24 = int_to_ptr.vmem [resolvable:$true] %s28_s24 }
   0x5   :  { %s2172_s27 = scalar_lea.hbm %s2692_s2, 256 }
   0x6   :  { %p2173_p0 = scmp.ne.s32.totalorder %s2692_s2, %s2172_s27  ;;  %p2176_p1 = scmp.lt.u32.totalorder %s2172_s27, %s2692_s2 }
   0x8   :  { %p2178_p2 = pnand %p2176_p1, %p2173_p0 }
   0xa   :  { %2181 = shalt.err (!%p2178_p2)
}
   0xb   :  { %s2182_s14 = scalar_lea.vmem %s41_s22, 256  ;;  %p2187_p4 = scmp.lt.s32.totalorder %s41_s22, %s41_s22 }
   0xc   :  { %p2183_p3 = scmp.ne.s32.totalorder %s41_s22, %s2182_s14  ;;  %p2188_p5 = scmp.lt.s32.totalorder %s2182_s14, %s2182_s14 }
   0xe   :  { %p2189_p6 = por %p2188_p5, %p2187_p4 }
  0x10   :  { %p2190_p7 = pnand %p2189_p6, %p2183_p3 }
  0x12   :  { %2193 = shalt.err (!%p2190_p7)
}
  0x13   :  { %s2292_s15 = smov 128   ;;  %s2293_s16 = smov 8  }
  0x14   :  { %46 = dma.hbm_to_vmem [thread:$0]  %s2692_s2, 256, %s41_s22, [#allocation9], %s2292_s15, %s2292_s15, %s2293_s16  }
  0x15   :  { %s2194_s21 = scalar_lea.hbm %s2691_s1, 256 }
  0x16   :  { %p2195_p8 = scmp.ne.s32.totalorder %s2691_s1, %s2194_s21  ;;  %p2198_p9 = scmp.lt.u32.totalorder %s2194_s21, %s2691_s1 }
  0x18   :  { %p2200_p10 = pnand %p2198_p9, %p2195_p8 }
  0x1a   :  { %2203 = shalt.err (!%p2200_p10)
}
  0x1b   :  { %s2204_s28 = scalar_lea.vmem %s2369_s24, 256  ;;  %p2209_p12 = scmp.lt.s32.totalorder %s2369_s24, %s2369_s24 }
  0x1c   :  { %p2205_p11 = scmp.ne.s32.totalorder %s2369_s24, %s2204_s28  ;;  %p2210_p13 = scmp.lt.s32.totalorder %s2204_s28, %s2204_s28 }
  0x1e   :  { %p2211_p0 = por %p2210_p13, %p2209_p12 }
  0x20   :  { %p2212_p1 = pnand %p2211_p0, %p2205_p11 }
  0x22   :  { %2215 = shalt.err (!%p2212_p1)
}
  0x23   :  { %34 = dma.hbm_to_vmem [thread:$0]  %s2691_s1, 256, %s2369_s24, [#allocation6], %s2292_s15, %s2292_s15, %s2293_s16  }
  0x24   :  { %s2294_s29 = smov [#allocation10]   ;;  %s2295_s13 = smov [#allocation11]  }
  0x25   :  { %s62_s30 = sshll.u32 %s2294_s29, 4  ;;  %s76_s14 = sshll.u32 %s2295_s13, 4  ;;  %s63_s30 = int_to_ptr.vmem [resolvable:$true] %s62_s30  ;;  %s2406_s14 = int_to_ptr.vmem [resolvable:$true] %s76_s14 }
  0x26   :  { %s2216_s19 = scalar_lea.hbm %s2698_s8, 512 }
  0x27   :  { %p2217_p2 = scmp.ne.s32.totalorder %s2698_s8, %s2216_s19  ;;  %p2220_p3 = scmp.lt.u32.totalorder %s2216_s19, %s2698_s8 }
  0x29   :  { %p2222_p4 = pnand %p2220_p3, %p2217_p2 }
  0x2b   :  { %2225 = shalt.err (!%p2222_p4)
}
  0x2c   :  { %s2226_s1 = scalar_lea.vmem %s63_s30, 512  ;;  %p2231_p6 = scmp.lt.s32.totalorder %s63_s30, %s63_s30 }
  0x2d   :  { %p2227_p5 = scmp.ne.s32.totalorder %s63_s30, %s2226_s1  ;;  %p2232_p7 = scmp.lt.s32.totalorder %s2226_s1, %s2226_s1 }
  0x2f   :  { %p2233_p8 = por %p2232_p7, %p2231_p6 }
  0x31   :  { %p2234_p9 = pnand %p2233_p8, %p2227_p5 }
  0x33   :  { %2237 = shalt.err (!%p2234_p9)
}
  0x34   :  { %68 = dma.hbm_to_vmem [thread:$0]  %s2698_s8, 512, %s63_s30, [#allocation9], %s2292_s15, %s2292_s15, %s2293_s16  }
  0x35   :  { %s2238_s2 = scalar_lea.hbm %s2700_s10, 512 }
  0x36   :  { %p2239_p10 = scmp.ne.s32.totalorder %s2700_s10, %s2238_s2  ;;  %p2242_p11 = scmp.lt.u32.totalorder %s2238_s2, %s2700_s10 }
  0x38   :  { %p2244_p12 = pnand %p2242_p11, %p2239_p10 }
  0x3a   :  { %2247 = shalt.err (!%p2244_p12)
}
  0x3b   :  { %s2248_s18 = scalar_lea.vmem %s2406_s14, 512  ;;  %p2253_p0 = scmp.lt.s32.totalorder %s2406_s14, %s2406_s14 }
  0x3c   :  { %p2249_p13 = scmp.ne.s32.totalorder %s2406_s14, %s2248_s18  ;;  %p2254_p1 = scmp.lt.s32.totalorder %s2248_s18, %s2248_s18 }
  0x3e   :  { %p2255_p2 = por %p2254_p1, %p2253_p0 }
  0x40   :  { %p2256_p3 = pnand %p2255_p2, %p2249_p13 }
  0x42   :  { %2259 = shalt.err (!%p2256_p3)
}
  0x43   :  { %82 = dma.hbm_to_vmem [thread:$0]  %s2700_s10, 512, %s2406_s14, [#allocation12], %s2292_s15, %s2292_s15, %s2293_s16  }
  0x44   :  { %2282 = dma.done.wait [#allocation6], 256  }
  0x45   :  { %2283 = vsyncadd [#allocation6], 4294967040 }
  0x46   :  { %2284 = dma.done.wait [#allocation9], 768  }
  0x47   :  { %2285 = vsyncadd [#allocation9], 4294966528 }
  0x48   :  { %2286 = dma.done.wait [#allocation12], 512  }
  0x49   :  { %2287 = vsyncadd [#allocation12], 4294966784  ;;  %vm116_vm0 = vcmask 261120   ;;  %v105_v0 = vld [vmem:[%s2696_s6] sm:$0xff]  ;;  %v106_v1 = vld [vmem:[%s2696_s6 + $0x8] sm:$0xff]  ;;  %v2296_v24 = vmov 0.0  }
  0x4a   :  { %v107_v2 = vld [vmem:[%s2696_s6 + $0x10] sm:$0xff]  ;;  %v2094_v3 = vpack.c.bf16 %v106_v1, %v105_v0  ;;  %v108_v4 = vld [vmem:[%s2696_s6 + $0x18] sm:$0xff]  ;;  %v296_v7 = vld [vmem:[%s2694_s4] sm:$0xff]  ;;  %vm2297_vm1 = vmmov 0   ;;  %vm392_vm2 = vcmask 64512   ;;  %s2298_s20 = smov 120  }
  0x4b   :  { %v101_v5 = vld [vmem:[#allocation5] sm:$0xff]  ;;  %v2098_v6 = vpack.c.bf16 %v108_v4, %v107_v2  ;;  %v297_v8 = vld [vmem:[%s2694_s4 + $0x8] sm:$0xff]  ;;  %v199_v10 = vld [vmem:[#allocation10 + $0x8] sm:$0xff]  ;;  %s2302_s8 = smov 24   ;;  %vm726_vm3 = vcmask 130112   ;;  %vm899_vm4 = vcmask 195712  }
  0x4c   :  { %1978 = vmatprep.mubr.msk.f32.mxu0 %vm116_vm0, %v101_v5  ;;  %2095 = vmatprep.subr.bf16.mxu0 %v2094_v3  ;;  %v198_v9 = vld [vmem:[#allocation10] sm:$0xff]  ;;  %v2110_v11 = vpack.c.bf16 %v297_v8, %v296_v7  ;;  %v299_v14 = vld [vmem:[%s2694_s4 + $0x18] sm:$0xff]  ;;  %v294_v17 = vld [vmem:[%s2690_s0] sm:$0xff]  ;;  %vm1072_vm5 = vcmask 261312   ;;  %s2303_s30 = smov [#allocation13]  }
  0x4d   :  { %2097 = vmatpush3.bf16.msra.mxu0 %v2094_v3  ;;  %v2102_v12 = vpack.c.bf16 %v199_v10, %v198_v9  ;;  %v298_v13 = vld [vmem:[%s2694_s4 + $0x10] sm:$0xff]  ;;  %v102_v15 = vld [vmem:[#allocation5 + $0x8] sm:$0xff]  ;;  %v295_v18 = vld [vmem:[%s2690_s0 + $0x8] sm:$0xff]  ;;  %s1857_s19 = sshll.u32 %s2303_s30, 4  ;;  %s1858_s19 = int_to_ptr.vmem [resolvable:$true] %s1857_s19 }
  0x4e   :  { %2099 = vmatprep.subr.bf16.mxu0 %v2098_v6  ;;  %v2114_v16 = vpack.c.bf16 %v299_v14, %v298_v13  ;;  %v200_v19 = vld [vmem:[#allocation10 + $0x10] sm:$0xff]  ;;  %v201_v20 = vld [vmem:[#allocation10 + $0x18] sm:$0xff]  ;;  %v1887_v55 = vld [vmem:[%s2693_s3 + $0x10] sm:$0xff]  ;;  %p2265_p5 = scmp.lt.s32.totalorder %s1858_s19, %s1858_s19 }
  0x4f   :  { %2103 = vmatprep.subr.bf16.mxu1 %v2102_v12  ;;  %v2106_v21 = vpack.c.bf16 %v201_v20, %v200_v19  ;;  %v103_v22 = vld [vmem:[#allocation8] sm:$0xff]  ;;  %v104_v23 = vld [vmem:[#allocation8 + $0x8] sm:$0xff]  ;;  %v1891_v60 = vld [vmem:[%s2693_s3 + $0x18] sm:$0xff] }
  0x50   :  { %2105 = vmatpush3.bf16.msra.mxu1 %v2102_v12  ;;  %1989 = vmatprep.mubr.msk.f32.mxu1 %vm116_vm0, %v103_v22  ;;  %v1871_v25 = vld [vmem:[%s2697_s7] ss:$0 sm:$0xff]  ;;  %s2299_s7 = smov 112   ;;  %v1899_v5 = vld [vmem:[%s2693_s3 + $0x28] sm:$0xff]  ;;  %v1903_v20 = vld [vmem:[%s2693_s3 + $0x30] sm:$0xff] }
  0x51   :  { %2101 = vmatpush3.bf16.msra.mxu0 %v2098_v6  ;;  %2107 = vmatprep.subr.bf16.mxu1 %v2106_v21  ;;  %v1877_v30 = vld [vmem:[%s2695_s5] ss:$0 sm:$0xff]  ;;  %s2300_s5 = smov 104  }
  0x52   :  { %2111 = vmatprep.subr.bf16.mxu0 %v2110_v11  ;;  %v1874_v37 = vld [vmem:[%s2699_s9] ss:$0 sm:$0xff] }
  0x53   :  { %v391_v50 = vld [vmem:[%s2693_s3] sm:$0xff] }
  0x54   :  { %1979 = vmatmul.mubr.msk.f32.vlgmr.msra.gmra.mrb[0].mxu0 %vm116_vm0, %v102_v15  ;;  %2109 = vmatpush3.bf16.msra.mxu1 %v2106_v21  ;;  %v1895_v0 = vld [vmem:[%s2693_s3 + $0x20] sm:$0xff] }
  0x55   :  { %2113 = vmatpush3.bf16.msra.mxu0 %v2110_v11  ;;  %2000 = vmatprep.mubr.msk.f32.mxu0 %vm116_vm0, %v294_v17 }
  0x56   :  { %2115 = vmatprep.subr.bf16.mxu0 %v2114_v16  ;;  %2003 = vmatprep.subr.mxu1 %v2296_v24 }
  0x57   :  { %1990 = vmatmul.mubr.msk.f32.vlgmr.msra.gmra.mrb[0].mxu1 %vm116_vm0, %v104_v23 }
  0x58   :  { %2005 = vmatprep.mubr.msk.f32.mxu1 %vm2297_vm1, %v2296_v24 }
  0x59   :  { %2117 = vmatpush3.bf16.msra.mxu0 %v2114_v16 }
  0x5a   :  { %2023 = vmatprep.subr.mxu0 %v2296_v24 }
  0x5c   :  { %2001 = vmatmul.mubr.msk.f32.vlgmr.msra.gmra.mrb[2].mxu0 %vm116_vm0, %v295_v18 }
  0x5d   :  { %2025 = vmatprep.mubr.msk.f32.mxu0 %vm2297_vm1, %v2296_v24 }
 0x127   :  { %v1980_v26 = vpop.f32.mrb[0].mxu0 }
 0x128   :  { %v195_v27 = vadd.f32 %v1980_v26, %v1871_v25  ;;  %v189_v28 = vpop.f32.mrb[1].mxu0 }
 0x129   :  { %v190_v29 = vadd.f32 %v1871_v25, %v189_v28  ;;  %v1907_v25 = vld [vmem:[%s2693_s3 + $0x38] sm:$0xff] }
 0x12a   :  { %291 = vst.msk [vmem:[#allocation2 + $0x8] sm:$0xff] %vm116_vm0, %v195_v27  ;;  %v1991_v38 = vpop.f32.mrb[0].mxu1 }
 0x12b   :  { %290 = vst.msk [vmem:[#allocation2] sm:$0xff] %vm116_vm0, %v190_v29  ;;  %v287_v39 = vadd.f32 %v1991_v38, %v1874_v37  ;;  %v281_v40 = vpop.f32.mrb[1].mxu1 }
 0x12c   :  { %v282_v41 = vadd.f32 %v1874_v37, %v281_v40 }
 0x12d   :  { %293 = vst.msk [vmem:[#allocation3 + $0x8] sm:$0xff] %vm116_vm0, %v287_v39 }
 0x12e   :  { %292 = vst.msk [vmem:[#allocation3] sm:$0xff] %vm116_vm0, %v282_v41 }
 0x12f   :  { %v2002_v31 = vpop.f32.mrb[2].mxu0 }
 0x130   :  { %v380_v32 = vpop.f32.mrb[3].mxu0  ;;  %v386_v36 = vadd.f32 %v2002_v31, %v1877_v30 }
 0x131   :  { %v381_v33 = vadd.f32 %v1877_v30, %v380_v32  ;;  %v1074_v35 = vld [vmem:[#allocation2 + $0x8] sm:$0xff] }
 0x132   :  { %v389_v34 = vld [vmem:[#allocation2] sm:$0xff]  ;;  %v1883_v32 = vld [vmem:[%s2693_s3 + $0x8] sm:$0xff]  ;;  %s2301_s3 = smov 16  }
 0x133   :  { %556 = vrot.lane.b32.xlu1 %v381_v33, %s2298_s20  ;;  %2004 = vmatpush3.xpose.msk.msra.mxu1 %vm392_vm2, %v389_v34 }
 0x134   :  { %2008 = vmatprep.subr.mxu1 %v2296_v24  ;;  %v2610_v38 = vld [vmem:[#allocation3 + $0x8] sm:$0xff] }
 0x135   :  { %v2512_v42 = vld [vmem:[#allocation3] sm:$0xff] }
 0x136   :  { %2006 = vmatmul.mubr.msk.f32.vlgmr.msra.gmra.mrb[2].mxu1 %vm392_vm2, %v381_v33 }
 0x137   :  { %732 = vrot.lane.b32.xlu1 %v389_v34, %s2299_s7  ;;  %2010 = vmatprep.mubr.msk.f32.mxu1 %vm2297_vm1, %v2296_v24 }
 0x138   :  { %2009 = vmatpush3.msra.mxu1 %v2512_v42 }
 0x139   :  { %2013 = vmatprep.subr.mxu1 %v2296_v24 }
 0x13b   :  { %730 = vrot.lane.b32.xlu1 %v381_v33, %s2299_s7 }
 0x13f   :  { %905 = vrot.lane.b32.xlu1 %v389_v34, %s2300_s5 }
 0x143   :  { %903 = vrot.lane.b32.xlu1 %v381_v33, %s2300_s5 }
 0x147   :  { %1243 = vrot.lane.b32.xlu1 %v1074_v35, %s2298_s20 }
 0x14b   :  { %1241 = vrot.lane.b32.xlu1 %v386_v36, %s2298_s20 }
 0x14f   :  { %1414 = vrot.lane.b32.xlu1 %v386_v36, %s2299_s7 }
 0x153   :  { %1586 = vrot.lane.b32.xlu1 %v386_v36, %s2300_s5 }
 0x1a5   :  { %v2516_v43 = vpop.permute.xlu1 %556 }
 0x1a9   :  { %v733_v44 = vpop.permute.xlu1 %732 }
 0x1aa   :  { %2024 = vmatpush3.xpose.msk.msra.mxu0 %vm392_vm2, %v733_v44 }
 0x1ab   :  { %2033 = vmatprep.subr.mxu0 %v2296_v24 }
 0x1ad   :  { %v731_v45 = vpop.permute.xlu1 %730 }
 0x1ae   :  { %2026 = vmatmul.mubr.msk.f32.vlgmr.msra.gmra.mrb[4].mxu0 %vm392_vm2, %v731_v45 }
 0x1af   :  { %2035 = vmatprep.mubr.msk.f32.mxu0 %vm2297_vm1, %v2296_v24 }
 0x1b1   :  { %v906_v46 = vpop.permute.xlu1 %905 }
 0x1b2   :  { %2034 = vmatpush3.xpose.msk.msra.mxu0 %vm392_vm2, %v906_v46 }
 0x1b3   :  { %2043 = vmatprep.subr.mxu0 %v2296_v24 }
 0x1b5   :  { %v904_v47 = vpop.permute.xlu1 %903 }
 0x1b6   :  { %2036 = vmatmul.mubr.msk.f32.vlgmr.msra.gmra.mrb[6].mxu0 %vm392_vm2, %v904_v47 }
 0x1b7   :  { %2044 = vmatpush3.xpose.msk.msra.mxu0 %vm392_vm2, %v1074_v35  ;;  %2045 = vmatprep.mubr.msk.f32.mxu0 %vm2297_vm1, %v2296_v24 }
 0x1b8   :  { %2053 = vmatprep.subr.mxu0 %v2296_v24 }
 0x1b9   :  { %v1244_v48 = vpop.permute.xlu1 %1243 }
 0x1ba   :  { %2046 = vmatmul.mubr.msk.f32.vlgmr.msra.gmra.mrb[8].mxu0 %vm392_vm2, %v386_v36 }
 0x1bb   :  { %2054 = vmatpush3.xpose.msk.msra.mxu0 %vm392_vm2, %v1244_v48  ;;  %2055 = vmatprep.mubr.msk.f32.mxu0 %vm2297_vm1, %v2296_v24 }
 0x1bc   :  { %2063 = vmatprep.subr.mxu0 %v2296_v24 }
 0x1bd   :  { %v1242_v49 = vpop.permute.xlu1 %1241 }
 0x1be   :  { %2056 = vmatmul.mubr.msk.f32.vlgmr.msra.gmra.mrb[10].mxu0 %vm392_vm2, %v1242_v49 }
 0x1bf   :  { %2065 = vmatprep.mubr.msk.f32.mxu0 %vm2297_vm1, %v2296_v24 }
 0x1c1   :  { %v1415_v16 = vpop.permute.xlu1 %1414 }
 0x1c5   :  { %v1587_v19 = vpop.permute.xlu1 %1586 }
 0x209   :  { %v465_v51 = vpop.f32.mrb[2].mxu1 }
 0x20a   :  { %v466_v52 = vadd.f32 %v465_v51, %v391_v50  ;;  %v2007_v53 = vpop.f32.mrb[3].mxu1 }
 0x20c   :  { %v469_v54 = vsel %vm392_vm2, %v466_v52, -inf }
 0x20d   :  { %470 = vmax.xlane.f32.xlu0 %v469_v54 }
 0x223   :  { %558 = vrot.lane.b32.xlu0 %v389_v34, %s2298_s20 }
 0x227   :  { %1416 = vrot.lane.b32.xlu0 %v1074_v35, %s2299_s7 }
 0x22b   :  { %1588 = vrot.lane.b32.xlu0 %v1074_v35, %s2300_s5 }
 0x281   :  { %v804_v56 = vpop.f32.mrb[4].mxu0 }
 0x282   :  { %v2548_v57 = vadd.f32 %v1887_v55, %v804_v56  ;;  %v2027_v58 = vpop.f32.mrb[5].mxu0 }
 0x284   :  { %v808_v59 = vsel %vm392_vm2, %v2548_v57, -inf }
 0x285   :  { %809 = vmax.xlane.f32.xlu1 %v808_v59 }
 0x289   :  { %v977_v61 = vpop.f32.mrb[6].mxu0 }
 0x28a   :  { %v2555_v62 = vadd.f32 %v1891_v60, %v977_v61  ;;  %v2037_v63 = vpop.f32.mrb[7].mxu0 }
 0x28c   :  { %v981_v1 = vsel %vm392_vm2, %v2555_v62, -inf }
 0x28d   :  { %v1150_v2 = vpop.f32.mrb[8].mxu0  ;;  %982 = vmax.xlane.f32.xlu0 %v981_v1 }
 0x28e   :  { %v2562_v3 = vadd.f32 %v1895_v0, %v1150_v2  ;;  %v2047_v4 = vpop.f32.mrb[9].mxu0 }
 0x290   :  { %v1154_v6 = vsel %vm392_vm2, %v2562_v3, -inf }
 0x291   :  { %v1315_v7 = vpop.f32.mrb[10].mxu0  ;;  %1155 = vmax.xlane.f32.xlu0 %v1154_v6 }
 0x292   :  { %v2569_v8 = vadd.f32 %v1899_v5, %v1315_v7  ;;  %v2057_v9 = vpop.f32.mrb[11].mxu0 }
 0x294   :  { %v1319_v10 = vsel %vm392_vm2, %v2569_v8, -inf }
 0x295   :  { %1320 = vmax.xlane.f32.xlu1 %v1319_v10 }
 0x29a   :  { %v471_v11 = vpop.xlane.xlu0 %470 }
 0x29b   :  { %v472_v12 = vsub.f32 %v466_v52, %v471_v11 }
 0x29d   :  { %v473_v13 = vmul.f32 1.442695, %v472_v12 }
 0x29e   :  { %v559_v14 = vpop.permute.xlu0 %558 }
 0x29f   :  { %2140 = vpow2.f32 %v473_v13 }
 0x2a2   :  { %v1417_v15 = vpop.permute.xlu0 %1416 }
 0x2a3   :  { %2064 = vmatpush3.xpose.msk.msra.mxu0 %vm392_vm2, %v1417_v15 }
 0x2a4   :  { %2073 = vmatprep.subr.mxu0 %v2296_v24 }
 0x2a6   :  { %2066 = vmatmul.mubr.msk.f32.vlgmr.msra.gmra.mrb[12].mxu0 %vm392_vm2, %v1415_v16  ;;  %v1589_v17 = vpop.permute.xlu0 %1588 }
 0x2a7   :  { %2074 = vmatpush3.xpose.msk.msra.mxu0 %vm392_vm2, %v1589_v17  ;;  %2075 = vmatprep.mubr.msk.f32.mxu0 %vm2297_vm1, %v2296_v24 }
 0x2a9   :  { %v2579_v18 = vpop.eup %2140 }
 0x2aa   :  { %2011 = vmatmul.mubr.msk.f32.vlgmr.msra.gmra.mrb[4].mxu1 %vm392_vm2, %v2579_v18  ;;  %2076 = vmatmul.mubr.msk.f32.vlgmr.msra.gmra.mrb[14].mxu0 %vm392_vm2, %v1587_v19  ;;  %v475_v6 = vsel %vm392_vm2, %v2579_v18, 0.0 }
 0x2ab   :  { %2014 = vmatpush3.xpose.msk.msra.mxu1 %vm392_vm2, %v559_v14  ;;  %2015 = vmatprep.mubr.msk.f32.mxu1 %vm2297_vm1, %v2296_v24 }
 0x2ac   :  { %2018 = vmatprep.subr.mxu1 %v2296_v24 }
 0x2ae   :  { %2016 = vmatmul.mubr.msk.f32.vlgmr.msra.gmra.mrb[6].mxu1 %vm392_vm2, %v2516_v43 }
 0x2af   :  { %2020 = vmatprep.mubr.msk.f32.mxu1 %vm2297_vm1, %v2296_v24 }
 0x312   :  { %v810_v41 = vpop.xlane.xlu1 %809 }
 0x313   :  { %v811_v43 = vsub.f32 %v2548_v57, %v810_v41  ;;  %v1758_v41 = vld [vmem:[#allocation11] sm:$0xff] }
 0x315   :  { %v812_v46 = vmul.f32 1.442695, %v811_v43  ;;  %v1759_v43 = vld [vmem:[#allocation11 + $0x8] sm:$0xff] }
 0x31a   :  { %v983_v39 = vpop.xlane.xlu0 %982 }
 0x31b   :  { %v984_v40 = vsub.f32 %v2555_v62, %v983_v39 }
 0x31d   :  { %v985_v44 = vmul.f32 1.442695, %v984_v40 }
 0x31e   :  { %v1156_v54 = vpop.xlane.xlu0 %1155 }
 0x31f   :  { %2142 = vpow2.f32 %v985_v44  ;;  %v1157_v62 = vsub.f32 %v2562_v3, %v1156_v54 }
 0x320   :  { %2144 = vpow2.f32 %v812_v46  ;;  %v2118_v46 = vpack.c.bf16 %v1759_v43, %v1758_v41 }
 0x321   :  { %v1158_v4 = vmul.f32 1.442695, %v1157_v62 }
 0x322   :  { %v1321_v45 = vpop.xlane.xlu1 %1320  ;;  %2119 = vmatprep.subr.bf16.mxu0 %v2118_v46 }
 0x323   :  { %v1322_v47 = vsub.f32 %v2569_v8, %v1321_v45  ;;  %2121 = vmatpush3.bf16.msra.mxu0 %v2118_v46 }
 0x329   :  { %v2143_v48 = vpop.eup %2142 }
 0x32a   :  { %v987_v49 = vsel %vm392_vm2, %v2143_v48, 0.0  ;;  %v2145_v50 = vpop.eup %2144 }
 0x32b   :  { %v814_v51 = vsel %vm392_vm2, %v2145_v50, 0.0 }
 0x379   :  { %v1488_v21 = vpop.f32.mrb[12].mxu0 }
 0x37a   :  { %v1489_v22 = vadd.f32 %v1903_v20, %v1488_v21  ;;  %v2067_v23 = vpop.f32.mrb[13].mxu0 }
 0x37c   :  { %v1492_v26 = vsel %vm392_vm2, %v1489_v22, -inf }
 0x37d   :  { %1493 = vmax.xlane.f32.xlu0 %v1492_v26  ;;  %v2599_v27 = vpop.f32.mrb[4].mxu1  ;;  %v1660_v28 = vpop.f32.mrb[14].mxu0 }
 0x37e   :  { %v1661_v29 = vadd.f32 %v1907_v25, %v1660_v28  ;;  %v2012_v30 = vpop.f32.mrb[5].mxu1  ;;  %v2077_v31 = vpop.f32.mrb[15].mxu0 }
 0x380   :  { %v1664_v33 = vsel %vm392_vm2, %v1661_v29, -inf }
 0x381   :  { %1665 = vmax.xlane.f32.xlu1 %v1664_v33  ;;  %v630_v34 = vpop.f32.mrb[6].mxu1 }
 0x382   :  { %v631_v35 = vadd.f32 %v1883_v32, %v630_v34  ;;  %v2017_v36 = vpop.f32.mrb[7].mxu1 }
 0x384   :  { %v634_v37 = vsel %vm392_vm2, %v631_v35, -inf }
 0x385   :  { %635 = vmax.xlane.f32.xlu0 %v634_v37 }
 0x392   :  { %817 = vrot.lane.b32.xlu1 %v2512_v42, %s2299_s7 }
 0x396   :  { %990 = vrot.lane.b32.xlu1 %v2512_v42, %s2300_s5 }
 0x39a   :  { %1501 = vrot.lane.b32.xlu1 %v2610_v38, %s2299_s7 }
 0x39b   :  { %644 = vrot.lane.b32.xlu0 %v2512_v42, %s2298_s20  ;;  %v1323_v42 = vmul.f32 1.442695, %v1322_v47  ;;  %v1760_v47 = vld [vmem:[#allocation11 + $0x10] sm:$0xff] }
 0x39d   :  { %2146 = vpow2.f32 %v1323_v42  ;;  %v1761_v42 = vld [vmem:[#allocation11 + $0x18] sm:$0xff] }
 0x39f   :  { %1329 = vrot.lane.b32.xlu0 %v2610_v38, %s2298_s20  ;;  %s2260_s20 = scalar_lea.vmem %s1858_s19, 256 }
 0x3a0   :  { %p2261_p4 = scmp.ne.s32.totalorder %s1858_s19, %s2260_s20  ;;  %p2266_p6 = scmp.lt.s32.totalorder %s2260_s20, %s2260_s20 }
 0x3a2   :  { %p2267_p7 = por %p2266_p6, %p2265_p5 }
 0x3a3   :  { %1673 = vrot.lane.b32.xlu0 %v2610_v38, %s2300_s5 }
 0x3a4   :  { %p2268_p8 = pnand %p2267_p7, %p2261_p4 }
 0x3a7   :  { %v2147_v52 = vpop.eup %2146 }
 0x3a8   :  { %v1325_v53 = vsel %vm392_vm2, %v2147_v52, 0.0 }
 0x3be   :  { %988 = vadd.xlane.f32.xlu1 %v987_v49 }
 0x3c2   :  { %815 = vadd.xlane.f32.xlu0 %v814_v51 }
 0x3c6   :  { %1326 = vadd.xlane.f32.xlu0 %v1325_v53 }
 0x40a   :  { %v1494_v55 = vpop.xlane.xlu0 %1493 }
 0x40b   :  { %v1495_v56 = vsub.f32 %v1489_v22, %v1494_v55 }
 0x40d   :  { %v1496_v57 = vmul.f32 1.442695, %v1495_v56 }
 0x40e   :  { %v1666_v58 = vpop.xlane.xlu1 %1665 }
 0x40f   :  { %2148 = vpow2.f32 %v1496_v57  ;;  %v1667_v59 = vsub.f32 %v1661_v29, %v1666_v58 }
 0x411   :  { %v1668_v63 = vmul.f32 1.442695, %v1667_v59 }
 0x412   :  { %v636_v60 = vpop.xlane.xlu0 %635  ;;  %v818_v7 = vpop.permute.xlu1 %817 }
 0x413   :  { %v637_v61 = vsub.f32 %v631_v35, %v636_v60 }
 0x415   :  { %v638_v0 = vmul.f32 1.442695, %v637_v61 }
 0x416   :  { %v645_v1 = vpop.permute.xlu0 %644  ;;  %v991_v10 = vpop.permute.xlu1 %990 }
 0x417   :  { %2150 = vpow2.f32 %v638_v0  ;;  %2019 = vmatpush3.msra.mxu1 %v645_v1 }
 0x418   :  { %2028 = vmatprep.subr.mxu1 %v2296_v24  ;;  %2152 = vpow2.f32 %v1668_v63 }
 0x419   :  { %v2149_v2 = vpop.eup %2148  ;;  %2154 = vpow2.f32 %v1158_v4 }
 0x41a   :  { %v1498_v5 = vsel %vm392_vm2, %v2149_v2, 0.0  ;;  %v1330_v14 = vpop.permute.xlu0 %1329  ;;  %v1502_v15 = vpop.permute.xlu1 %1501 }
 0x41b   :  { %1499 = vadd.xlane.f32.xlu0 %v1498_v5 }
 0x41e   :  { %v1674_v16 = vpop.permute.xlu0 %1673 }
 0x41f   :  { %476 = vadd.xlane.f32.xlu0 %v475_v6  ;;  %v1911_v6 = vld [vmem:[%s2701_s11] ss:$0 sm:$0xff] }
 0x421   :  { %v2151_v3 = vpop.eup %2150 }
 0x422   :  { %2021 = vmatmul.mubr.msk.f32.vlgmr.msra.gmra.mrb[8].mxu1 %vm392_vm2, %v2151_v3  ;;  %v640_v8 = vsel %vm392_vm2, %v2151_v3, 0.0  ;;  %v2153_v9 = vpop.eup %2152 }
 0x423   :  { %2029 = vmatpush3.msra.mxu1 %v818_v7  ;;  %641 = vadd.xlane.f32.xlu1 %v640_v8  ;;  %v1670_v11 = vsel %vm392_vm2, %v2153_v9, 0.0  ;;  %v2155_v12 = vpop.eup %2154 }
 0x424   :  { %2030 = vmatprep.mubr.msk.f32.mxu1 %vm2297_vm1, %v2296_v24  ;;  %2038 = vmatprep.subr.mxu1 %v2296_v24  ;;  %v1160_v13 = vsel %vm392_vm2, %v2155_v12, 0.0 }
 0x426   :  { %2031 = vmatmul.mubr.msk.f32.vlgmr.msra.gmra.mrb[10].mxu1 %vm392_vm2, %v2145_v50 }
 0x427   :  { %2039 = vmatpush3.msra.mxu1 %v991_v10  ;;  %1671 = vadd.xlane.f32.xlu1 %v1670_v11 }
 0x428   :  { %2040 = vmatprep.mubr.msk.f32.mxu1 %vm2297_vm1, %v2296_v24  ;;  %2048 = vmatprep.subr.mxu1 %v2296_v24 }
 0x42a   :  { %2041 = vmatmul.mubr.msk.f32.vlgmr.msra.gmra.mrb[12].mxu1 %vm392_vm2, %v2143_v48  ;;  %v2122_v48 = vpack.c.bf16 %v1761_v42, %v1760_v47 }
 0x42b   :  { %2049 = vmatpush3.msra.mxu1 %v2610_v38  ;;  %1161 = vadd.xlane.f32.xlu1 %v1160_v13 }
 0x42c   :  { %2050 = vmatprep.mubr.msk.f32.mxu1 %vm2297_vm1, %v2296_v24  ;;  %2058 = vmatprep.subr.mxu1 %v2296_v24 }
 0x42d   :  { %2123 = vmatprep.subr.bf16.mxu0 %v2122_v48 }
 0x42e   :  { %2051 = vmatmul.mubr.msk.f32.vlgmr.msra.gmra.mrb[14].mxu1 %vm392_vm2, %v2155_v12  ;;  %2125 = vmatpush3.bf16.msra.mxu0 %v2122_v48 }
 0x42f   :  { %2059 = vmatpush3.msra.mxu1 %v1330_v14  ;;  %2060 = vmatprep.mubr.msk.f32.mxu1 %vm2297_vm1, %v2296_v24 }
 0x430   :  { %2068 = vmatprep.subr.mxu1 %v2296_v24 }
 0x432   :  { %2061 = vmatmul.mubr.msk.f32.vlgmr.msra.gmra.mrb[16].mxu1 %vm392_vm2, %v2147_v52 }
 0x433   :  { %2069 = vmatpush3.msra.mxu1 %v1502_v15  ;;  %2070 = vmatprep.mubr.msk.f32.mxu1 %vm2297_vm1, %v2296_v24 }
 0x434   :  { %2078 = vmatprep.subr.mxu1 %v2296_v24 }
 0x436   :  { %2071 = vmatmul.mubr.msk.f32.vlgmr.msra.gmra.mrb[18].mxu1 %vm392_vm2, %v2149_v2 }
 0x437   :  { %2079 = vmatpush3.msra.mxu1 %v1674_v16  ;;  %2080 = vmatprep.mubr.msk.f32.mxu1 %vm2297_vm1, %v2296_v24 }
 0x43a   :  { %2081 = vmatmul.mubr.msk.f32.vlgmr.msra.gmra.mrb[20].mxu1 %vm392_vm2, %v2153_v9 }
 0x44b   :  { %v989_v23 = vpop.xlane.xlu1 %988 }
 0x44f   :  { %v816_v17 = vpop.xlane.xlu0 %815 }
 0x453   :  { %v1327_v18 = vpop.xlane.xlu0 %1326 }
 0x4a8   :  { %v1500_v19 = vpop.xlane.xlu0 %1499 }
 0x4ac   :  { %v477_v20 = vpop.xlane.xlu0 %476 }
 0x4ad   :  { %2156 = vrcp.f32 %v477_v20 }
 0x4b0   :  { %v642_v25 = vpop.xlane.xlu1 %641 }
 0x4b1   :  { %2158 = vrcp.f32 %v642_v25 }
 0x4b2   :  { %2160 = vrcp.f32 %v816_v17 }
 0x4b3   :  { %2162 = vrcp.f32 %v989_v23 }
 0x4b4   :  { %v1672_v26 = vpop.xlane.xlu1 %1671 }
 0x4b7   :  { %v2157_v21 = vpop.eup %2156 }
 0x4b8   :  { %v552_v22 = vmul.f32 %v2157_v21, %v2599_v27  ;;  %v1162_v28 = vpop.xlane.xlu1 %1161 }
 0x4b9   :  { %2164 = vrcp.f32 %v1162_v28 }
 0x4ba   :  { %553 = vst.msk [vmem:[#allocation4] sm:$0xff] %vm392_vm2, %v552_v22  ;;  %2166 = vrcp.f32 %v1327_v18 }
 0x4bb   :  { %v2159_v24 = vpop.eup %2158  ;;  %2168 = vrcp.f32 %v1500_v19 }
 0x4bc   :  { %v2161_v32 = vpop.eup %2160  ;;  %2170 = vrcp.f32 %v1672_v26 }
 0x4bd   :  { %v2163_v35 = vpop.eup %2162 }
 0x4c3   :  { %v2165_v39 = vpop.eup %2164 }
 0x4c4   :  { %v2167_v49 = vpop.eup %2166 }
 0x4c5   :  { %v2169_v53 = vpop.eup %2168 }
 0x4c6   :  { %v2171_v57 = vpop.eup %2170 }
 0x4f5   :  { %v716_v29 = vpop.f32.mrb[8].mxu1 }
 0x4f6   :  { %v721_v30 = vmul.f32 %v2159_v24, %v716_v29  ;;  %v2022_v31 = vpop.f32.mrb[9].mxu1 }
 0x4f8   :  { %723 = vrot.lane.b32.xlu0 %v721_v30, %s2293_s16 }
 0x4f9   :  { %v889_v33 = vpop.f32.mrb[10].mxu1 }
 0x4fa   :  { %v894_v34 = vmul.f32 %v2161_v32, %v889_v33  ;;  %v2032_v27 = vpop.f32.mrb[11].mxu1 }
 0x4fc   :  { %896 = vrot.lane.b32.xlu1 %v894_v34, %s2301_s3 }
 0x4fd   :  { %v1062_v36 = vpop.f32.mrb[12].mxu1 }
 0x4fe   :  { %v1067_v37 = vmul.f32 %v2163_v35, %v1062_v36  ;;  %v2042_v38 = vpop.f32.mrb[13].mxu1 }
 0x500   :  { %1069 = vrot.lane.b32.xlu0 %v1067_v37, %s2302_s8 }
 0x501   :  { %v1232_v40 = vpop.f32.mrb[14].mxu1 }
 0x502   :  { %v1237_v44 = vmul.f32 %v2165_v39, %v1232_v40  ;;  %v2052_v45 = vpop.f32.mrb[15].mxu1 }
 0x504   :  { %1238 = vst.msk [vmem:[#allocation4 + $0x8] sm:$0xff] %vm392_vm2, %v1237_v44 }
 0x505   :  { %v1401_v50 = vpop.f32.mrb[16].mxu1 }
 0x506   :  { %v1406_v51 = vmul.f32 %v2167_v49, %v1401_v50  ;;  %v2062_v52 = vpop.f32.mrb[17].mxu1 }
 0x508   :  { %1408 = vrot.lane.b32.xlu1 %v1406_v51, %s2293_s16 }
 0x509   :  { %v1573_v54 = vpop.f32.mrb[18].mxu1 }
 0x50a   :  { %v1578_v55 = vmul.f32 %v2169_v53, %v1573_v54  ;;  %v2072_v56 = vpop.f32.mrb[19].mxu1 }
 0x50c   :  { %1580 = vrot.lane.b32.xlu1 %v1578_v55, %s2301_s3 }
 0x50d   :  { %v1745_v58 = vpop.f32.mrb[20].mxu1 }
 0x50e   :  { %v1750_v59 = vmul.f32 %v2171_v57, %v1745_v58  ;;  %v2082_v60 = vpop.f32.mrb[21].mxu1 }
 0x510   :  { %1752 = vrot.lane.b32.xlu0 %v1750_v59, %s2302_s8 }
 0x56a   :  { %v724_v61 = vpop.permute.xlu0 %723 }
 0x56b   :  { %727 = vst.msk [vmem:[#allocation4] sm:$0xff] %vm726_vm3, %v724_v61 }
 0x56e   :  { %v897_v62 = vpop.permute.xlu1 %896 }
 0x56f   :  { %900 = vst.msk [vmem:[#allocation4] sm:$0xff] %vm899_vm4, %v897_v62 }
 0x572   :  { %v1070_v63 = vpop.permute.xlu0 %1069 }
 0x573   :  { %1073 = vst.msk [vmem:[#allocation4] sm:$0xff] %vm1072_vm5, %v1070_v63 }
 0x57a   :  { %v1409_v0 = vpop.permute.xlu1 %1408  ;;  %v1756_v1 = vld [vmem:[#allocation4] sm:$0xff] }
 0x57b   :  { %1411 = vst.msk [vmem:[#allocation4 + $0x8] sm:$0xff] %vm726_vm3, %v1409_v0  ;;  %2091 = vmatprep.mubr.msk.f32.mxu0 %vm116_vm0, %v1756_v1 }
 0x57e   :  { %v1581_v2 = vpop.permute.xlu1 %1580 }
 0x57f   :  { %1583 = vst.msk [vmem:[#allocation4 + $0x8] sm:$0xff] %vm899_vm4, %v1581_v2 }
 0x582   :  { %v1753_v4 = vpop.permute.xlu0 %1752 }
 0x583   :  { %1755 = vst.msk [vmem:[#allocation4 + $0x8] sm:$0xff] %vm1072_vm5, %v1753_v4 }
 0x58a   :  { %v1757_v5 = vld [vmem:[#allocation4 + $0x8] sm:$0xff] }
 0x58b   :  { %2092 = vmatmul.mubr.msk.f32.vlgmr.msra.gmra.mrb[16].mxu0 %vm116_vm0, %v1757_v5 }
 0x65e   :  { %v2093_v7 = vpop.f32.mrb[16].mxu0 }
 0x65f   :  { %v1847_v3 = vadd.f32 %v2093_v7, %v1911_v6  ;;  %v1841_v8 = vpop.f32.mrb[17].mxu0 }
 0x660   :  { %v1842_v9 = vadd.f32 %v1911_v6, %v1841_v8 }
 0x661   :  { %1851 = vst.msk [vmem:[#allocation13 + $0x8] sm:$0xff] %vm116_vm0, %v1847_v3 }
 0x662   :  { %1850 = vst.msk [vmem:[#allocation13] sm:$0xff] %vm116_vm0, %v1842_v9 }
 0x663   :  { %2271 = shalt.err (!%p2268_p8)
}
 0x664   :  { %s2272_s5 = scalar_lea.hbm %s2702_s12, 256 }
 0x665   :  { %p2273_p9 = scmp.ne.s32.totalorder %s2702_s12, %s2272_s5  ;;  %p2276_p10 = scmp.lt.u32.totalorder %s2272_s5, %s2702_s12 }
 0x667   :  { %p2278_p11 = pnand %p2276_p10, %p2273_p9 }
 0x669   :  { %2281 = shalt.err (!%p2278_p11)
}
 0x66a   :  { %1863 = dma.vmem_to_hbm [thread:$0]  %s1858_s19, 256, %s2702_s12, [#allocation7], %s2292_s15, %s2292_s15, %s2293_s16  }
 0x66b   :  { %2288 = dma.done.wait [#allocation7], 256  }
 0x66c   :  { %2289 = vsyncadd [#allocation7], 4294967040 }
 0x66d   :  { %1867 = vsyncpa [#allocation6], 1 }
 0x66e   :  { %1868 = vsyncpa [#allocation9], 1 }
 0x66f   :  { %1869 = vsyncpa [#allocation12], 1 }
 0x670   :  { %1870 = vsyncpa [#allocation7], 1 }

</bundles_post_ra>
